<compile_context>
chip_gen: v6e
topology: v6e:2x2x1
jax: 0.10.0
libtpu: 0.0.40
codegen_flags: <defaults>
</compile_context>

<pallas_src>
import numpy as np
import jax
import jax.numpy as jnp
from jax.experimental import pallas as pl
from jax.experimental.pallas import tpu as pltpu

# ----------------------------- configuration -------------------------------
B = 2
IN_FEATURES = 4
OUT_FEATURES = 8
D = H = W = 8
KERNELS = [3, 5]
STRIDES = [1, 1]          # im2col path assumes stride 1 (asserted below)
PADDINGS = [1, 2]
R, L = 8, 16
DIM_D = max(IN_FEATURES // R, L)   # = 16
M = len(KERNELS)
BN_EPS = 1e-5
PAD_MAX = max(PADDINGS)

# K per branch = Cin*k^3 (+1 bias row), padded to a multiple of 128.
K_PADS = tuple(int(np.ceil((IN_FEATURES * k ** 3 + 1) / 128.0)) * 128
               for k in KERNELS)                # (128, 512)


# ----------------------------- fused Pallas kernel --------------------------
def _fused_kernel(p0_ref, p1_ref, w0_ref, w1_ref,
                  fcwT_ref, fcb_ref, scw_ref, scb_ref, o_ref):
    # p*_ref : (K_pad, S)   bf16  transposed im2col patches (+ ones row), one sample
    # w*_ref : (Cout, K_pad) bf16 BN-folded conv weights (+ bias column)
    # fcwT_ref: (M, Cout, d) f32   per-branch fc weights, transposed
    # fcb_ref : (M, 1, d)    f32   per-branch fc bias (row)
    # scw_ref : (Cout, d)    f32   shared 1x1-conv weight
    # scb_ref : (Cout, 1)    f32   shared 1x1-conv bias (column)
    # o_ref   : (Cout, S)    f32   attention-weighted sum of both branches
    branches = ((p0_ref, w0_ref), (p1_ref, w1_ref))
    out = None
    for m, (p_ref, w_ref) in enumerate(branches):
        # Conv3d + BatchNorm + bias, as one lane-dense MXU matmul; ReLU epilogue.
        fea = jnp.dot(w_ref[...], p_ref[...],
                      preferred_element_type=jnp.float32)          # (Cout, S)
        fea = jnp.maximum(fea, 0.0)
        # Global average pool over this sample's spatial positions (lane reduce).
        gap = jnp.mean(fea, axis=1, keepdims=True)                 # (Cout, 1)
        # Branch fc:  z = fc_w @ gap + fc_b   (VPU broadcast + sublane reduce).
        z = jnp.sum(fcwT_ref[m] * gap, axis=0, keepdims=True) + fcb_ref[m]   # (1, d)
        # Shared 1x1 conv + sigmoid:  att = sigmoid(sc_w @ z + sc_b)  (lane reduce).
        logit = jnp.sum(scw_ref[...] * z, axis=1, keepdims=True) + scb_ref[...]  # (Cout,1)
        att = jax.nn.sigmoid(logit)
        contrib = att * fea                                        # (Cout, S)
        out = contrib if out is None else out + contrib
    o_ref[...] = out


def _fused_call(p0, p1, w0, w1, fcwT, fcb, scw, scb, *, batch, s_per_batch):
    cout = w0.shape[0]
    k0p, n = p0.shape
    k1p = p1.shape[0]
    m, _, d = fcwT.shape
    return pl.pallas_call(
        _fused_kernel,
        out_shape=jax.ShapeDtypeStruct((cout, n), jnp.float32),
        grid_spec=pltpu.PrefetchScalarGridSpec(
            num_scalar_prefetch=0,
            grid=(batch,),
            in_specs=[
                pl.BlockSpec((k0p, s_per_batch), lambda b: (0, b)),
                pl.BlockSpec((k1p, s_per_batch), lambda b: (0, b)),
                pl.BlockSpec((cout, k0p), lambda b: (0, 0)),
                pl.BlockSpec((cout, k1p), lambda b: (0, 0)),
                pl.BlockSpec((m, cout, d), lambda b: (0, 0, 0)),
                pl.BlockSpec((m, 1, d), lambda b: (0, 0, 0)),
                pl.BlockSpec((cout, d), lambda b: (0, 0)),
                pl.BlockSpec((cout, 1), lambda b: (0, 0)),
            ],
            out_specs=pl.BlockSpec((cout, s_per_batch), lambda b: (0, b)),
        ),
        compiler_params=pltpu.CompilerParams(
            dimension_semantics=("parallel",)),
    )(p0, p1, w0, w1, fcwT, fcb, scw, scb)


# ------------------------------ JAX glue ------------------------------------
def _lane_dense_patches(xpad_bf16, k, pad, k_pad, Dd, Hh, Ww):
    """Transposed im2col: (K_pad, B*D*H*W) bf16, with a trailing ones row."""
    Bn, Cin = xpad_bf16.shape[:2]
    off = PAD_MAX - pad
    cols = []
    for dz in range(k):
        for dy in range(k):
            for dx in range(k):
                cols.append(xpad_bf16[:, :,
                                      off + dz: off + dz + Dd,
                                      off + dy: off + dy + Hh,
                                      off + dx: off + dx + Ww])
    pt = jnp.stack(cols, axis=0)                         # (k^3, B, Cin, D, H, W)
    pt = pt.transpose(2, 0, 1, 3, 4, 5)                  # (Cin, k^3, B, D, H, W)
    pt = pt.reshape(Cin * k ** 3, Bn * Dd * Hh * Ww)     # (K, B*S)
    ones = jnp.ones((1, pt.shape[1]), pt.dtype)          # bias row
    pt = jnp.concatenate([pt, ones], axis=0)
    return jnp.pad(pt, ((0, k_pad - pt.shape[0]), (0, 0)))


def _fold_conv_bn(conv_w, conv_b, gamma, beta, mean, var, k_pad):
    """Fold eval-mode BN into conv weights; bias as one extra K column; bf16."""
    cout = conv_w.shape[0]
    scale = gamma / jnp.sqrt(var + BN_EPS)                       # (Cout,)
    w = conv_w.reshape(cout, -1) * scale[:, None]                # (Cout, K)
    bias = (conv_b - mean) * scale + beta                        # (Cout,)
    w = jnp.concatenate([w, bias[:, None]], axis=1)              # (Cout, K+1)
    w = jnp.pad(w, ((0, 0), (0, k_pad - w.shape[1])))
    return w.astype(jnp.bfloat16)


@jax.jit
def mrfusion_att_forward(x, params):
    assert all(s == 1 for s in STRIDES), "im2col path assumes stride 1"
    Bn, Cin, Dd, Hh, Ww = x.shape
    Cout = params["conv_w"][0].shape[0]
    S = Dd * Hh * Ww

    # Pad once with the largest padding; each branch slices with its own offset.
    xpad = jnp.pad(x.astype(jnp.bfloat16),
                   ((0, 0), (0, 0),
                    (PAD_MAX, PAD_MAX), (PAD_MAX, PAD_MAX), (PAD_MAX, PAD_MAX)))

    p0 = _lane_dense_patches(xpad, KERNELS[0], PADDINGS[0], K_PADS[0], Dd, Hh, Ww)
    p1 = _lane_dense_patches(xpad, KERNELS[1], PADDINGS[1], K_PADS[1], Dd, Hh, Ww)
    w0 = _fold_conv_bn(params["conv_w"][0], params["conv_b"][0],
                       params["bn_gamma"][0], params["bn_beta"][0],
                       params["bn_mean"][0], params["bn_var"][0], K_PADS[0])
    w1 = _fold_conv_bn(params["conv_w"][1], params["conv_b"][1],
                       params["bn_gamma"][1], params["bn_beta"][1],
                       params["bn_mean"][1], params["bn_var"][1], K_PADS[1])

    fcwT = jnp.stack([w.T for w in params["fc_w"]], axis=0)      # (M, Cout, d)
    fcb = jnp.stack(params["fc_b"], axis=0)[:, None, :]          # (M, 1, d)
    scw = params["sc_w"]                                          # (Cout, d)
    scb = params["sc_b"][:, None]                                 # (Cout, 1)

    out_flat = _fused_call(p0, p1, w0, w1, fcwT, fcb, scw, scb,
                           batch=Bn, s_per_batch=S)               # (Cout, B*S)
    out = out_flat.reshape(Cout, Bn, Dd, Hh, Ww).transpose(1, 0, 2, 3, 4)
    return out                                                    # (B, Cout, D, H, W)


# -------------------------- pure-JAX reference ------------------------------
def reference_forward(x, params):
    feas, gaps = [], []
    for i in range(M):
        w, b = params["conv_w"][i], params["conv_b"][i]
        pad = PADDINGS[i]
        y = jax.lax.conv_general_dilated(
            x, w, window_strides=(1, 1, 1), padding=[(pad, pad)] * 3,
            dimension_numbers=("NCDHW", "OIDHW", "NCDHW"))
        y = y + b[None, :, None, None, None]
        scale = params["bn_gamma"][i] / jnp.sqrt(params["bn_var"][i] + BN_EPS)
        y = (y - params["bn_mean"][i][None, :, None, None, None]) * \
            scale[None, :, None, None, None] + \
            params["bn_beta"][i][None, :, None, None, None]
        y = jnp.maximum(y, 0.0)
        feas.append(y)
        gaps.append(jnp.mean(y, axis=(2, 3, 4)))
    zs = [gaps[i] @ params["fc_w"][i].T + params["fc_b"][i] for i in range(M)]
    vectors = jnp.stack(zs, axis=-1)                           # (B, d, M)
    att = jax.nn.sigmoid(jnp.einsum("cd,bdm->bcm", params["sc_w"], vectors)
                         + params["sc_b"][None, :, None])      # (B, Cout, M)
    out = sum(att[:, :, m][:, :, None, None, None] * feas[m] for m in range(M))
    return out


# ------------------------------- main ----------------------------------------
def init_params(key):
    params = {"conv_w": [], "conv_b": [], "bn_gamma": [], "bn_beta": [],
              "bn_mean": [], "bn_var": [], "fc_w": [], "fc_b": []}
    for i in range(M):
        k = KERNELS[i]
        key, *ks = jax.random.split(key, 7)
        params["conv_w"].append(
            0.1 * jax.random.normal(ks[0], (OUT_FEATURES, IN_FEATURES, k, k, k), jnp.float32))
        params["conv_b"].append(0.1 * jax.random.normal(ks[1], (OUT_FEATURES,), jnp.float32))
        params["bn_gamma"].append(jax.random.uniform(ks[2], (OUT_FEATURES,), jnp.float32, 0.5, 1.5))
        params["bn_beta"].append(0.1 * jax.random.normal(ks[3], (OUT_FEATURES,), jnp.float32))
        params["bn_mean"].append(0.1 * jax.random.normal(ks[4], (OUT_FEATURES,), jnp.float32))
        params["bn_var"].append(jax.random.uniform(ks[5], (OUT_FEATURES,), jnp.float32, 0.5, 1.5))
    for i in range(M):
        key, k1, k2 = jax.random.split(key, 3)
        params["fc_w"].append(0.2 * jax.random.normal(k1, (DIM_D, OUT_FEATURES), jnp.float32))
        params["fc_b"].append(0.1 * jax.random.normal(k2, (DIM_D,), jnp.float32))
    key, k1, k2 = jax.random.split(key, 3)
    params["sc_w"] = 0.2 * jax.random.normal(k1, (OUT_FEATURES, DIM_D), jnp.float32)
    params["sc_b"] = 0.1 * jax.random.normal(k2, (OUT_FEATURES,), jnp.float32)
    return params


if __name__ == "__main__":
    key = jax.random.PRNGKey(0)
    key, xk = jax.random.split(key)
    x = jax.random.normal(xk, (B, IN_FEATURES, D, H, W), jnp.float32)
    params = init_params(key)

    out = jax.block_until_ready(mrfusion_att_forward(x, params))
    ref = jax.block_until_ready(reference_forward(x, params))

    assert out.shape == (B, OUT_FEATURES, D, H, W), out.shape
    np.testing.assert_allclose(np.asarray(out), np.asarray(ref), rtol=5e-2, atol=5e-2)

    print("KERNEL_OK")
</pallas_src>

<mosaic_0001>
module attributes {stable_mosaic.version = 11 : i64} {
  func.func @_fused_kernel(%arg0: i32, %arg1: memref<128x512xbf16, #tpu.memory_space<vmem>>, %arg2: memref<512x512xbf16, #tpu.memory_space<vmem>>, %arg3: memref<8x128xbf16, #tpu.memory_space<vmem>>, %arg4: memref<8x512xbf16, #tpu.memory_space<vmem>>, %arg5: memref<2x8x16xf32, #tpu.memory_space<vmem>>, %arg6: memref<2x1x16xf32, #tpu.memory_space<vmem>>, %arg7: memref<8x16xf32, #tpu.memory_space<vmem>>, %arg8: memref<8x1xf32, #tpu.memory_space<vmem>>, %arg9: memref<8x512xf32, #tpu.memory_space<vmem>>) attributes {dimension_semantics = [#tpu.dimension_semantics<parallel>], iteration_bounds = array<i64: 2>, scalar_prefetch = 0 : i64, scratch_operands = 0 : i64, tpu.core_type = #tpu.core_type<tc>, window_params = [{transform_indices = @transform_0, window_bounds = array<i64: 128, 512>}, {transform_indices = @transform_1, window_bounds = array<i64: 512, 512>}, {pipeline_mode = #tpu.pipeline_mode<synchronous>, transform_indices = @transform_2, window_bounds = array<i64: 8, 128>}, {pipeline_mode = #tpu.pipeline_mode<synchronous>, transform_indices = @transform_3, window_bounds = array<i64: 8, 512>}, {pipeline_mode = #tpu.pipeline_mode<synchronous>, transform_indices = @transform_4, window_bounds = array<i64: 2, 8, 16>}, {pipeline_mode = #tpu.pipeline_mode<synchronous>, transform_indices = @transform_5, window_bounds = array<i64: 2, 1, 16>}, {pipeline_mode = #tpu.pipeline_mode<synchronous>, transform_indices = @transform_6, window_bounds = array<i64: 8, 16>}, {pipeline_mode = #tpu.pipeline_mode<synchronous>, transform_indices = @transform_7, window_bounds = array<i64: 8, 1>}, {transform_indices = @transform_8, window_bounds = array<i64: 8, 512>}]} {
    %c0 = arith.constant 0 : index
    %c0_0 = arith.constant 0 : index
    %0 = vector.load %arg3[%c0, %c0_0] : memref<8x128xbf16, #tpu.memory_space<vmem>>, vector<8x128xbf16>
    %c0_1 = arith.constant 0 : index
    %c0_2 = arith.constant 0 : index
    %1 = vector.load %arg1[%c0_1, %c0_2] : memref<128x512xbf16, #tpu.memory_space<vmem>>, vector<128x512xbf16>
    %cst = arith.constant dense<0.000000e+00> : vector<8x512xf32>
    %2 = tpu.matmul %0, %1, %cst {dimension_numbers = #tpu.dot_dimension_numbers<[1], [0], [0], [1], [0, 0, 1, 1], [], []>} : vector<8x128xbf16>, vector<128x512xbf16>, vector<8x512xf32> -> vector<8x512xf32>
    %cst_3 = arith.constant 0.000000e+00 : f32
    %3 = vector.broadcast %cst_3 : f32 to vector<8x512xf32>
    %4 = arith.maximumf %2, %3 : vector<8x512xf32>
    %cst_4 = arith.constant dense<0.000000e+00> : vector<8xf32>
    %5 = vector.multi_reduction <add>, %4, %cst_4 [1] : vector<8x512xf32> to vector<8xf32>
    %6 = vector.shape_cast %5 : vector<8xf32> to vector<8x1xf32>
    %cst_5 = arith.constant 5.120000e+02 : f32
    %7 = vector.broadcast %cst_5 : f32 to vector<8x1xf32>
    %8 = arith.divf %6, %7 : vector<8x1xf32>
    %c0_6 = arith.constant 0 : index
    %c0_7 = arith.constant 0 : index
    %c0_8 = arith.constant 0 : index
    %9 = vector.load %arg5[%c0_6, %c0_7, %c0_8] : memref<2x8x16xf32, #tpu.memory_space<vmem>>, vector<1x8x16xf32>
    %10 = vector.shape_cast %9 : vector<1x8x16xf32> to vector<8x16xf32>
    %11 = vector.broadcast %8 : vector<8x1xf32> to vector<8x16xf32>
    %12 = arith.mulf %10, %11 : vector<8x16xf32>
    %cst_9 = arith.constant dense<0.000000e+00> : vector<16xf32>
    %13 = vector.multi_reduction <add>, %12, %cst_9 [0] : vector<8x16xf32> to vector<16xf32>
    %14 = vector.shape_cast %13 : vector<16xf32> to vector<1x16xf32>
    %c0_10 = arith.constant 0 : index
    %c0_11 = arith.constant 0 : index
    %c0_12 = arith.constant 0 : index
    %15 = vector.load %arg6[%c0_10, %c0_11, %c0_12] : memref<2x1x16xf32, #tpu.memory_space<vmem>>, vector<1x1x16xf32>
    %16 = vector.shape_cast %15 : vector<1x1x16xf32> to vector<1x16xf32>
    %17 = arith.addf %14, %16 : vector<1x16xf32>
    %c0_13 = arith.constant 0 : index
    %c0_14 = arith.constant 0 : index
    %18 = vector.load %arg7[%c0_13, %c0_14] : memref<8x16xf32, #tpu.memory_space<vmem>>, vector<8x16xf32>
    %19 = vector.broadcast %17 : vector<1x16xf32> to vector<8x16xf32>
    %20 = arith.mulf %18, %19 : vector<8x16xf32>
    %cst_15 = arith.constant dense<0.000000e+00> : vector<8xf32>
    %21 = vector.multi_reduction <add>, %20, %cst_15 [1] : vector<8x16xf32> to vector<8xf32>
    %22 = vector.shape_cast %21 : vector<8xf32> to vector<8x1xf32>
    %c0_16 = arith.constant 0 : index
    %c0_17 = arith.constant 0 : index
    %23 = vector.load %arg8[%c0_16, %c0_17] : memref<8x1xf32, #tpu.memory_space<vmem>>, vector<8x1xf32>
    %24 = arith.addf %22, %23 : vector<8x1xf32>
    %25 = arith.negf %24 : vector<8x1xf32>
    %26 = math.exp %25 : vector<8x1xf32>
    %cst_18 = arith.constant 1.000000e+00 : f32
    %27 = vector.broadcast %cst_18 : f32 to vector<8x1xf32>
    %28 = arith.addf %27, %26 : vector<8x1xf32>
    %29 = arith.divf %27, %28 : vector<8x1xf32>
    %30 = vector.broadcast %29 : vector<8x1xf32> to vector<8x512xf32>
    %31 = arith.mulf %30, %4 : vector<8x512xf32>
    %c0_19 = arith.constant 0 : index
    %c0_20 = arith.constant 0 : index
    %32 = vector.load %arg4[%c0_19, %c0_20] : memref<8x512xbf16, #tpu.memory_space<vmem>>, vector<8x512xbf16>
    %c0_21 = arith.constant 0 : index
    %c0_22 = arith.constant 0 : index
    %33 = vector.load %arg2[%c0_21, %c0_22] : memref<512x512xbf16, #tpu.memory_space<vmem>>, vector<512x512xbf16>
    %cst_23 = arith.constant dense<0.000000e+00> : vector<8x512xf32>
    %34 = tpu.matmul %32, %33, %cst_23 {dimension_numbers = #tpu.dot_dimension_numbers<[1], [0], [0], [1], [0, 0, 1, 1], [], []>} : vector<8x512xbf16>, vector<512x512xbf16>, vector<8x512xf32> -> vector<8x512xf32>
    %cst_24 = arith.constant 0.000000e+00 : f32
    %35 = vector.broadcast %cst_24 : f32 to vector<8x512xf32>
    %36 = arith.maximumf %34, %35 : vector<8x512xf32>
    %cst_25 = arith.constant dense<0.000000e+00> : vector<8xf32>
    %37 = vector.multi_reduction <add>, %36, %cst_25 [1] : vector<8x512xf32> to vector<8xf32>
    %38 = vector.shape_cast %37 : vector<8xf32> to vector<8x1xf32>
    %cst_26 = arith.constant 5.120000e+02 : f32
    %39 = vector.broadcast %cst_26 : f32 to vector<8x1xf32>
    %40 = arith.divf %38, %39 : vector<8x1xf32>
    %c1 = arith.constant 1 : index
    %c0_27 = arith.constant 0 : index
    %c0_28 = arith.constant 0 : index
    %41 = vector.load %arg5[%c1, %c0_27, %c0_28] : memref<2x8x16xf32, #tpu.memory_space<vmem>>, vector<1x8x16xf32>
    %42 = vector.shape_cast %41 : vector<1x8x16xf32> to vector<8x16xf32>
    %43 = vector.broadcast %40 : vector<8x1xf32> to vector<8x16xf32>
    %44 = arith.mulf %42, %43 : vector<8x16xf32>
    %cst_29 = arith.constant dense<0.000000e+00> : vector<16xf32>
    %45 = vector.multi_reduction <add>, %44, %cst_29 [0] : vector<8x16xf32> to vector<16xf32>
    %46 = vector.shape_cast %45 : vector<16xf32> to vector<1x16xf32>
    %c1_30 = arith.constant 1 : index
    %c0_31 = arith.constant 0 : index
    %c0_32 = arith.constant 0 : index
    %47 = vector.load %arg6[%c1_30, %c0_31, %c0_32] : memref<2x1x16xf32, #tpu.memory_space<vmem>>, vector<1x1x16xf32>
    %48 = vector.shape_cast %47 : vector<1x1x16xf32> to vector<1x16xf32>
    %49 = arith.addf %46, %48 : vector<1x16xf32>
    %c0_33 = arith.constant 0 : index
    %c0_34 = arith.constant 0 : index
    %50 = vector.load %arg7[%c0_33, %c0_34] : memref<8x16xf32, #tpu.memory_space<vmem>>, vector<8x16xf32>
    %51 = vector.broadcast %49 : vector<1x16xf32> to vector<8x16xf32>
    %52 = arith.mulf %50, %51 : vector<8x16xf32>
    %cst_35 = arith.constant dense<0.000000e+00> : vector<8xf32>
    %53 = vector.multi_reduction <add>, %52, %cst_35 [1] : vector<8x16xf32> to vector<8xf32>
    %54 = vector.shape_cast %53 : vector<8xf32> to vector<8x1xf32>
    %c0_36 = arith.constant 0 : index
    %c0_37 = arith.constant 0 : index
    %55 = vector.load %arg8[%c0_36, %c0_37] : memref<8x1xf32, #tpu.memory_space<vmem>>, vector<8x1xf32>
    %56 = arith.addf %54, %55 : vector<8x1xf32>
    %57 = arith.negf %56 : vector<8x1xf32>
    %58 = math.exp %57 : vector<8x1xf32>
    %cst_38 = arith.constant 1.000000e+00 : f32
    %59 = vector.broadcast %cst_38 : f32 to vector<8x1xf32>
    %60 = arith.addf %59, %58 : vector<8x1xf32>
    %61 = arith.divf %59, %60 : vector<8x1xf32>
    %62 = vector.broadcast %61 : vector<8x1xf32> to vector<8x512xf32>
    %63 = arith.mulf %62, %36 : vector<8x512xf32>
    %64 = arith.addf %31, %63 : vector<8x512xf32>
    %c0_39 = arith.constant 0 : index
    %c0_40 = arith.constant 0 : index
    %65 = vector.load %arg9[%c0_39, %c0_40] : memref<8x512xf32, #tpu.memory_space<vmem>>, vector<8x512xf32>
    tpu.vector_store %arg9[%c0_39, %c0_40], %64 {strides = array<i32>} : memref<8x512xf32, #tpu.memory_space<vmem>>, vector<8x512xf32>,
    return
  }
  func.func @transform_0(%arg0: i32) -> (i32, i32) {
    %c0_i32 = arith.constant 0 : i32
    %c0_i32_0 = arith.constant 0 : i32
    return %c0_i32, %arg0 : i32, i32
  }
  func.func @transform_1(%arg0: i32) -> (i32, i32) {
    %c0_i32 = arith.constant 0 : i32
    %c0_i32_0 = arith.constant 0 : i32
    return %c0_i32, %arg0 : i32, i32
  }
  func.func @transform_2(%arg0: i32) -> (i32, i32) {
    %c0_i32 = arith.constant 0 : i32
    %c0_i32_0 = arith.constant 0 : i32
    %c0_i32_1 = arith.constant 0 : i32
    return %c0_i32, %c0_i32_0 : i32, i32
  }
  func.func @transform_3(%arg0: i32) -> (i32, i32) {
    %c0_i32 = arith.constant 0 : i32
    %c0_i32_0 = arith.constant 0 : i32
    %c0_i32_1 = arith.constant 0 : i32
    return %c0_i32, %c0_i32_0 : i32, i32
  }
  func.func @transform_4(%arg0: i32) -> (i32, i32, i32) {
    %c0_i32 = arith.constant 0 : i32
    %c0_i32_0 = arith.constant 0 : i32
    %c0_i32_1 = arith.constant 0 : i32
    %c0_i32_2 = arith.constant 0 : i32
    return %c0_i32, %c0_i32_0, %c0_i32_1 : i32, i32, i32
  }
  func.func @transform_5(%arg0: i32) -> (i32, i32, i32) {
    %c0_i32 = arith.constant 0 : i32
    %c0_i32_0 = arith.constant 0 : i32
    %c0_i32_1 = arith.constant 0 : i32
    %c0_i32_2 = arith.constant 0 : i32
    return %c0_i32, %c0_i32_0, %c0_i32_1 : i32, i32, i32
  }
  func.func @transform_6(%arg0: i32) -> (i32, i32) {
    %c0_i32 = arith.constant 0 : i32
    %c0_i32_0 = arith.constant 0 : i32
    %c0_i32_1 = arith.constant 0 : i32
    return %c0_i32, %c0_i32_0 : i32, i32
  }
  func.func @transform_7(%arg0: i32) -> (i32, i32) {
    %c0_i32 = arith.constant 0 : i32
    %c0_i32_0 = arith.constant 0 : i32
    %c0_i32_1 = arith.constant 0 : i32
    return %c0_i32, %c0_i32_0 : i32, i32
  }
  func.func @transform_8(%arg0: i32) -> (i32, i32) {
    %c0_i32 = arith.constant 0 : i32
    %c0_i32_0 = arith.constant 0 : i32
    return %c0_i32, %arg0 : i32, i32
  }
}

</mosaic_0001>

<bundles_post_ra>
// kernel: mrfusion_att_forward.1
= control target key start
LH: loop header
LB: loop body
LE: loop exit
PB: predicated region body
PF: predicated region fallthrough
CT: control target
= control target key end

     0   :  { %s2629_s27 = smov 0   ;;  %s2631_s28 = smov 0   ;;  %s3305_s0 = inlined_call_operand.vmem [shape: bf16[128,1024], index: 0, kind: input, shape index: {}]   ;;  %s3306_s1 = inlined_call_operand.vmem [shape: bf16[512,1024], index: 1, kind: input, shape index: {}]   ;;  %s3307_s2 = inlined_call_operand.vmem [shape: bf16[8,128], index: 2, kind: input, shape index: {}]   ;;  %s3308_s3 = inlined_call_operand.vmem [shape: bf16[8,512], index: 3, kind: input, shape index: {}]   ;;  %s3309_s4 = inlined_call_operand.vmem [shape: f32[2,8,16], index: 4, kind: input, shape index: {}]   ;;  %s3310_s5 = inlined_call_operand.vmem [shape: f32[2,1,16], index: 5, kind: input, shape index: {}]   ;;  %s3311_s6 = inlined_call_operand.vmem [shape: f32[8,16], index: 6, kind: input, shape index: {}]   ;;  %s3312_s7 = inlined_call_operand.vmem [shape: f32[8,1], index: 7, kind: input, shape index: {}]   ;;  %s3313_s8 = inlined_call_operand.vmem [shape: f32[8,1024], index: 8, kind: output, shape index: {}]  }
   0x1   :  { %s2633_s29 = smov 0  }
   0x2 LB: > { %s2093_s30 = sadd.s32 4294967295, %s2581_s29   ;;  %s2646_s9 = sadd.s32 1, %s2581_s29   ;;  %s2581_s29 = sphi %s2633_s29, %s3317_s29   ;;  %s2577_s28 = sphi %s2631_s28, %s3316_s28   ;;  %s2573_s27 = sphi %s2629_s27, %s3315_s27  }
   0x3   : > { %s22_s10 = ssub.s32 %s2581_s29, %s2646_s9  ;;  %s25_s11 = sadd.s32 1, %s2577_s28 }
   0x4   : > { %p23_p0 = scmp.eq.s32.totalorder %s22_s10, 0  ;;  %p32_p1 = scmp.ne.s32.totalorder %s2577_s28, %s2573_s27 }
   0x5   : > { %p33_p2 = scmp.eq.s32.totalorder %s2581_s29, 0  ;;  %p2096_p4 = scmp.ge.s32.totalorder %s2581_s29, 2 }
   0x6   : > { %s2655_s12 = scalar_select %p23_p0, %s2577_s28, %s25_s11  }
   0x7   : > { %p2657_p3 = por %p33_p2, %p32_p1  ;;  %254 = sbr.rel (%p2096_p4) target bundleno = 100 (0x64), region = 40 }
   0xc   : > { %257 = sbr.rel (!%p2657_p3) target bundleno = 32 (0x20), region = 44  ;;  %s259_s14 = sand.u32 (%p2657_p3), 1, %s2577_s28  }
   0xd   : > { %s2278_s15 = sshll.u32 (%p2657_p3), %s2581_s29, 4  ;;  %s2097_s16 = sshll.u32 (%p2657_p3), %s259_s14, 8 }
   0xe   : > { %s2669_s19 = scalar_lea.vmem (%p2657_p3), %s3305_s0, %s2278_s15  ;;  %s2674_s20 = scalar_lea.vmem (%p2657_p3), [#allocation2], %s2097_s16 }
   0xf   : > { %v277_v0 = vld [vmem:[%s2669_s19] sm:$0xff] (%p2657_p3)  ;;  %v279_v1 = vld [vmem:[%s2669_s19 + $0x8] sm:$0xff] (%p2657_p3) }
  0x10   : > { %v281_v2 = vld [vmem:[%s2669_s19 + $0x20] sm:$0xff] (%p2657_p3)  ;;  %278 = vst [vmem:[%s2674_s20] sm:$0xff] (%p2657_p3), %v277_v0  ;;  %280 = vst [vmem:[%s2674_s20 + $0x8] sm:$0xff] (%p2657_p3), %v279_v1  ;;  %v283_v3 = vld [vmem:[%s2669_s19 + $0x28] sm:$0xff] (%p2657_p3) }
  0x11   : > { %282 = vst [vmem:[%s2674_s20 + $0x10] sm:$0xff] %v281_v2  ;;  %v285_v4 = vld [vmem:[%s2669_s19 + $0x40] sm:$0xff]  ;;  %v287_v5 = vld [vmem:[%s2669_s19 + $0x48] sm:$0xff]  ;;  %284 = vst [vmem:[%s2674_s20 + $0x18] sm:$0xff] %v283_v3 }
  0x12   : > { %286 = vst [vmem:[%s2674_s20 + $0x20] sm:$0xff] %v285_v4  ;;  %288 = vst [vmem:[%s2674_s20 + $0x28] sm:$0xff] %v287_v5  ;;  %v289_v6 = vld [vmem:[%s2669_s19 + $0x60] sm:$0xff]  ;;  %v291_v7 = vld [vmem:[%s2669_s19 + $0x68] sm:$0xff] }
  0x13   : > { %v293_v8 = vld [vmem:[%s2669_s19 + $0x80] sm:$0xff]  ;;  %290 = vst [vmem:[%s2674_s20 + $0x30] sm:$0xff] %v289_v6  ;;  %292 = vst [vmem:[%s2674_s20 + $0x38] sm:$0xff] %v291_v7  ;;  %v295_v9 = vld [vmem:[%s2669_s19 + $0x88] sm:$0xff] }
  0x14   : > { %294 = vst [vmem:[%s2674_s20 + $0x40] sm:$0xff] %v293_v8  ;;  %v297_v10 = vld [vmem:[%s2669_s19 + $0xa0] sm:$0xff]  ;;  %v299_v11 = vld [vmem:[%s2669_s19 + $0xa8] sm:$0xff]  ;;  %296 = vst [vmem:[%s2674_s20 + $0x48] sm:$0xff] %v295_v9 }
  0x15   : > { %298 = vst [vmem:[%s2674_s20 + $0x50] sm:$0xff] %v297_v10  ;;  %300 = vst [vmem:[%s2674_s20 + $0x58] sm:$0xff] %v299_v11  ;;  %v301_v12 = vld [vmem:[%s2669_s19 + $0xc0] sm:$0xff]  ;;  %v303_v13 = vld [vmem:[%s2669_s19 + $0xc8] sm:$0xff] }
  0x16   : > { %v305_v14 = vld [vmem:[%s2669_s19 + $0xe0] sm:$0xff]  ;;  %302 = vst [vmem:[%s2674_s20 + $0x60] sm:$0xff] %v301_v12  ;;  %304 = vst [vmem:[%s2674_s20 + $0x68] sm:$0xff] %v303_v13  ;;  %v307_v15 = vld [vmem:[%s2669_s19 + $0xe8] sm:$0xff] }
  0x17   : > { %306 = vst [vmem:[%s2674_s20 + $0x70] sm:$0xff] %v305_v14  ;;  %v309_v16 = vld [vmem:[%s2669_s19 + $0x100] sm:$0xff]  ;;  %v311_v17 = vld [vmem:[%s2669_s19 + $0x108] sm:$0xff]  ;;  %308 = vst [vmem:[%s2674_s20 + $0x78] sm:$0xff] %v307_v15 }
  0x18   : > { %310 = vst [vmem:[%s2674_s20 + $0x80] sm:$0xff] %v309_v16  ;;  %312 = vst [vmem:[%s2674_s20 + $0x88] sm:$0xff] %v311_v17  ;;  %v313_v18 = vld [vmem:[%s2669_s19 + $0x120] sm:$0xff]  ;;  %v315_v19 = vld [vmem:[%s2669_s19 + $0x128] sm:$0xff] }
  0x19   : > { %v317_v20 = vld [vmem:[%s2669_s19 + $0x140] sm:$0xff]  ;;  %314 = vst [vmem:[%s2674_s20 + $0x90] sm:$0xff] %v313_v18  ;;  %316 = vst [vmem:[%s2674_s20 + $0x98] sm:$0xff] %v315_v19  ;;  %v319_v21 = vld [vmem:[%s2669_s19 + $0x148] sm:$0xff] }
  0x1a   : > { %318 = vst [vmem:[%s2674_s20 + $0xa0] sm:$0xff] %v317_v20  ;;  %v321_v22 = vld [vmem:[%s2669_s19 + $0x160] sm:$0xff]  ;;  %v323_v23 = vld [vmem:[%s2669_s19 + $0x168] sm:$0xff]  ;;  %320 = vst [vmem:[%s2674_s20 + $0xa8] sm:$0xff] %v319_v21 }
  0x1b   : > { %322 = vst [vmem:[%s2674_s20 + $0xb0] sm:$0xff] %v321_v22  ;;  %324 = vst [vmem:[%s2674_s20 + $0xb8] sm:$0xff] %v323_v23  ;;  %v325_v24 = vld [vmem:[%s2669_s19 + $0x180] sm:$0xff]  ;;  %v327_v25 = vld [vmem:[%s2669_s19 + $0x188] sm:$0xff] }
  0x1c   : > { %v329_v26 = vld [vmem:[%s2669_s19 + $0x1a0] sm:$0xff]  ;;  %326 = vst [vmem:[%s2674_s20 + $0xc0] sm:$0xff] %v325_v24  ;;  %328 = vst [vmem:[%s2674_s20 + $0xc8] sm:$0xff] %v327_v25  ;;  %v331_v27 = vld [vmem:[%s2669_s19 + $0x1a8] sm:$0xff] }
  0x1d   : > { %330 = vst [vmem:[%s2674_s20 + $0xd0] sm:$0xff] %v329_v26  ;;  %v333_v28 = vld [vmem:[%s2669_s19 + $0x1c0] sm:$0xff]  ;;  %v335_v29 = vld [vmem:[%s2669_s19 + $0x1c8] sm:$0xff]  ;;  %332 = vst [vmem:[%s2674_s20 + $0xd8] sm:$0xff] %v331_v27 }
  0x1e   : > { %334 = vst [vmem:[%s2674_s20 + $0xe0] sm:$0xff] %v333_v28  ;;  %336 = vst [vmem:[%s2674_s20 + $0xe8] sm:$0xff] %v335_v29  ;;  %v337_v30 = vld [vmem:[%s2669_s19 + $0x1e0] sm:$0xff]  ;;  %v339_v31 = vld [vmem:[%s2669_s19 + $0x1e8] sm:$0xff] }
  0x1f   : > { %338 = vst [vmem:[%s2674_s20 + $0xf0] sm:$0xff] %v337_v30  ;;  %340 = vst [vmem:[%s2674_s20 + $0xf8] sm:$0xff] %v339_v31 }
  0x20 PF: > { %346 = sbr.rel (!%p2657_p3) target bundleno = 100 (0x64), region = 67  ;;  %s348_s21 = sand.u32 (%p2657_p3), 1, %s2577_s28  }
  0x21   : > { %s2279_s22 = sshll.u32 (%p2657_p3), %s2581_s29, 4  ;;  %s2100_s23 = sshll.u32 (%p2657_p3), %s348_s21, 10 }
  0x22   : > { %s2744_s26 = scalar_lea.vmem (%p2657_p3), %s3306_s1, %s2279_s22  ;;  %s2749_s10 = scalar_lea.vmem (%p2657_p3), [#allocation3], %s2100_s23 }
  0x23   : > { %v366_v32 = vld [vmem:[%s2744_s26] sm:$0xff] (%p2657_p3)  ;;  %v368_v33 = vld [vmem:[%s2744_s26 + $0x8] sm:$0xff] (%p2657_p3) }
  0x24   : > { %v370_v34 = vld [vmem:[%s2744_s26 + $0x20] sm:$0xff] (%p2657_p3)  ;;  %367 = vst [vmem:[%s2749_s10] sm:$0xff] (%p2657_p3), %v366_v32  ;;  %369 = vst [vmem:[%s2749_s10 + $0x8] sm:$0xff] (%p2657_p3), %v368_v33  ;;  %v372_v35 = vld [vmem:[%s2744_s26 + $0x28] sm:$0xff] (%p2657_p3) }
  0x25   : > { %371 = vst [vmem:[%s2749_s10 + $0x10] sm:$0xff] %v370_v34  ;;  %v374_v36 = vld [vmem:[%s2744_s26 + $0x40] sm:$0xff]  ;;  %v376_v37 = vld [vmem:[%s2744_s26 + $0x48] sm:$0xff]  ;;  %373 = vst [vmem:[%s2749_s10 + $0x18] sm:$0xff] %v372_v35 }
  0x26   : > { %375 = vst [vmem:[%s2749_s10 + $0x20] sm:$0xff] %v374_v36  ;;  %377 = vst [vmem:[%s2749_s10 + $0x28] sm:$0xff] %v376_v37  ;;  %v378_v38 = vld [vmem:[%s2744_s26 + $0x60] sm:$0xff]  ;;  %v380_v39 = vld [vmem:[%s2744_s26 + $0x68] sm:$0xff] }
  0x27   : > { %v382_v40 = vld [vmem:[%s2744_s26 + $0x80] sm:$0xff]  ;;  %379 = vst [vmem:[%s2749_s10 + $0x30] sm:$0xff] %v378_v38  ;;  %381 = vst [vmem:[%s2749_s10 + $0x38] sm:$0xff] %v380_v39  ;;  %v384_v41 = vld [vmem:[%s2744_s26 + $0x88] sm:$0xff] }
  0x28   : > { %383 = vst [vmem:[%s2749_s10 + $0x40] sm:$0xff] %v382_v40  ;;  %v386_v42 = vld [vmem:[%s2744_s26 + $0xa0] sm:$0xff]  ;;  %v388_v43 = vld [vmem:[%s2744_s26 + $0xa8] sm:$0xff]  ;;  %385 = vst [vmem:[%s2749_s10 + $0x48] sm:$0xff] %v384_v41 }
  0x29   : > { %387 = vst [vmem:[%s2749_s10 + $0x50] sm:$0xff] %v386_v42  ;;  %389 = vst [vmem:[%s2749_s10 + $0x58] sm:$0xff] %v388_v43  ;;  %v390_v44 = vld [vmem:[%s2744_s26 + $0xc0] sm:$0xff]  ;;  %v392_v45 = vld [vmem:[%s2744_s26 + $0xc8] sm:$0xff] }
  0x2a   : > { %v394_v46 = vld [vmem:[%s2744_s26 + $0xe0] sm:$0xff]  ;;  %391 = vst [vmem:[%s2749_s10 + $0x60] sm:$0xff] %v390_v44  ;;  %393 = vst [vmem:[%s2749_s10 + $0x68] sm:$0xff] %v392_v45  ;;  %v396_v47 = vld [vmem:[%s2744_s26 + $0xe8] sm:$0xff] }
  0x2b   : > { %395 = vst [vmem:[%s2749_s10 + $0x70] sm:$0xff] %v394_v46  ;;  %v398_v48 = vld [vmem:[%s2744_s26 + $0x100] sm:$0xff]  ;;  %v400_v49 = vld [vmem:[%s2744_s26 + $0x108] sm:$0xff]  ;;  %397 = vst [vmem:[%s2749_s10 + $0x78] sm:$0xff] %v396_v47 }
  0x2c   : > { %399 = vst [vmem:[%s2749_s10 + $0x80] sm:$0xff] %v398_v48  ;;  %401 = vst [vmem:[%s2749_s10 + $0x88] sm:$0xff] %v400_v49  ;;  %v402_v50 = vld [vmem:[%s2744_s26 + $0x120] sm:$0xff]  ;;  %v404_v51 = vld [vmem:[%s2744_s26 + $0x128] sm:$0xff] }
  0x2d   : > { %v406_v52 = vld [vmem:[%s2744_s26 + $0x140] sm:$0xff]  ;;  %403 = vst [vmem:[%s2749_s10 + $0x90] sm:$0xff] %v402_v50  ;;  %405 = vst [vmem:[%s2749_s10 + $0x98] sm:$0xff] %v404_v51  ;;  %v408_v53 = vld [vmem:[%s2744_s26 + $0x148] sm:$0xff] }
  0x2e   : > { %407 = vst [vmem:[%s2749_s10 + $0xa0] sm:$0xff] %v406_v52  ;;  %v410_v54 = vld [vmem:[%s2744_s26 + $0x160] sm:$0xff]  ;;  %v412_v55 = vld [vmem:[%s2744_s26 + $0x168] sm:$0xff]  ;;  %409 = vst [vmem:[%s2749_s10 + $0xa8] sm:$0xff] %v408_v53 }
  0x2f   : > { %411 = vst [vmem:[%s2749_s10 + $0xb0] sm:$0xff] %v410_v54  ;;  %413 = vst [vmem:[%s2749_s10 + $0xb8] sm:$0xff] %v412_v55  ;;  %v414_v56 = vld [vmem:[%s2744_s26 + $0x180] sm:$0xff]  ;;  %v416_v57 = vld [vmem:[%s2744_s26 + $0x188] sm:$0xff] }
  0x30   : > { %v418_v58 = vld [vmem:[%s2744_s26 + $0x1a0] sm:$0xff]  ;;  %415 = vst [vmem:[%s2749_s10 + $0xc0] sm:$0xff] %v414_v56  ;;  %417 = vst [vmem:[%s2749_s10 + $0xc8] sm:$0xff] %v416_v57  ;;  %v420_v59 = vld [vmem:[%s2744_s26 + $0x1a8] sm:$0xff] }
  0x31   : > { %419 = vst [vmem:[%s2749_s10 + $0xd0] sm:$0xff] %v418_v58  ;;  %v422_v60 = vld [vmem:[%s2744_s26 + $0x1c0] sm:$0xff]  ;;  %v424_v61 = vld [vmem:[%s2744_s26 + $0x1c8] sm:$0xff]  ;;  %421 = vst [vmem:[%s2749_s10 + $0xd8] sm:$0xff] %v420_v59 }
  0x32   : > { %423 = vst [vmem:[%s2749_s10 + $0xe0] sm:$0xff] %v422_v60  ;;  %425 = vst [vmem:[%s2749_s10 + $0xe8] sm:$0xff] %v424_v61  ;;  %v426_v62 = vld [vmem:[%s2744_s26 + $0x1e0] sm:$0xff]  ;;  %v428_v63 = vld [vmem:[%s2744_s26 + $0x1e8] sm:$0xff] }
  0x33   : > { %v430_v0 = vld [vmem:[%s2744_s26 + $0x200] sm:$0xff]  ;;  %427 = vst [vmem:[%s2749_s10 + $0xf0] sm:$0xff] %v426_v62  ;;  %429 = vst [vmem:[%s2749_s10 + $0xf8] sm:$0xff] %v428_v63  ;;  %v432_v1 = vld [vmem:[%s2744_s26 + $0x208] sm:$0xff] }
  0x34   : > { %431 = vst [vmem:[%s2749_s10 + $0x100] sm:$0xff] %v430_v0  ;;  %v434_v2 = vld [vmem:[%s2744_s26 + $0x220] sm:$0xff]  ;;  %v436_v3 = vld [vmem:[%s2744_s26 + $0x228] sm:$0xff]  ;;  %433 = vst [vmem:[%s2749_s10 + $0x108] sm:$0xff] %v432_v1 }
  0x35   : > { %435 = vst [vmem:[%s2749_s10 + $0x110] sm:$0xff] %v434_v2  ;;  %437 = vst [vmem:[%s2749_s10 + $0x118] sm:$0xff] %v436_v3  ;;  %v438_v4 = vld [vmem:[%s2744_s26 + $0x240] sm:$0xff]  ;;  %v440_v5 = vld [vmem:[%s2744_s26 + $0x248] sm:$0xff] }
  0x36   : > { %v442_v6 = vld [vmem:[%s2744_s26 + $0x260] sm:$0xff]  ;;  %439 = vst [vmem:[%s2749_s10 + $0x120] sm:$0xff] %v438_v4  ;;  %441 = vst [vmem:[%s2749_s10 + $0x128] sm:$0xff] %v440_v5  ;;  %v444_v7 = vld [vmem:[%s2744_s26 + $0x268] sm:$0xff] }
  0x37   : > { %443 = vst [vmem:[%s2749_s10 + $0x130] sm:$0xff] %v442_v6  ;;  %v446_v8 = vld [vmem:[%s2744_s26 + $0x280] sm:$0xff]  ;;  %v448_v9 = vld [vmem:[%s2744_s26 + $0x288] sm:$0xff]  ;;  %445 = vst [vmem:[%s2749_s10 + $0x138] sm:$0xff] %v444_v7 }
  0x38   : > { %447 = vst [vmem:[%s2749_s10 + $0x140] sm:$0xff] %v446_v8  ;;  %449 = vst [vmem:[%s2749_s10 + $0x148] sm:$0xff] %v448_v9  ;;  %v450_v10 = vld [vmem:[%s2744_s26 + $0x2a0] sm:$0xff]  ;;  %v452_v11 = vld [vmem:[%s2744_s26 + $0x2a8] sm:$0xff] }
  0x39   : > { %v454_v12 = vld [vmem:[%s2744_s26 + $0x2c0] sm:$0xff]  ;;  %451 = vst [vmem:[%s2749_s10 + $0x150] sm:$0xff] %v450_v10  ;;  %453 = vst [vmem:[%s2749_s10 + $0x158] sm:$0xff] %v452_v11  ;;  %v456_v13 = vld [vmem:[%s2744_s26 + $0x2c8] sm:$0xff] }
  0x3a   : > { %455 = vst [vmem:[%s2749_s10 + $0x160] sm:$0xff] %v454_v12  ;;  %v458_v14 = vld [vmem:[%s2744_s26 + $0x2e0] sm:$0xff]  ;;  %v460_v15 = vld [vmem:[%s2744_s26 + $0x2e8] sm:$0xff]  ;;  %457 = vst [vmem:[%s2749_s10 + $0x168] sm:$0xff] %v456_v13 }
  0x3b   : > { %459 = vst [vmem:[%s2749_s10 + $0x170] sm:$0xff] %v458_v14  ;;  %461 = vst [vmem:[%s2749_s10 + $0x178] sm:$0xff] %v460_v15  ;;  %v462_v16 = vld [vmem:[%s2744_s26 + $0x300] sm:$0xff]  ;;  %v464_v17 = vld [vmem:[%s2744_s26 + $0x308] sm:$0xff] }
  0x3c   : > { %v466_v18 = vld [vmem:[%s2744_s26 + $0x320] sm:$0xff]  ;;  %463 = vst [vmem:[%s2749_s10 + $0x180] sm:$0xff] %v462_v16  ;;  %465 = vst [vmem:[%s2749_s10 + $0x188] sm:$0xff] %v464_v17  ;;  %v468_v19 = vld [vmem:[%s2744_s26 + $0x328] sm:$0xff] }
  0x3d   : > { %467 = vst [vmem:[%s2749_s10 + $0x190] sm:$0xff] %v466_v18  ;;  %v470_v20 = vld [vmem:[%s2744_s26 + $0x340] sm:$0xff]  ;;  %v472_v21 = vld [vmem:[%s2744_s26 + $0x348] sm:$0xff]  ;;  %469 = vst [vmem:[%s2749_s10 + $0x198] sm:$0xff] %v468_v19 }
  0x3e   : > { %471 = vst [vmem:[%s2749_s10 + $0x1a0] sm:$0xff] %v470_v20  ;;  %473 = vst [vmem:[%s2749_s10 + $0x1a8] sm:$0xff] %v472_v21  ;;  %v474_v22 = vld [vmem:[%s2744_s26 + $0x360] sm:$0xff]  ;;  %v476_v23 = vld [vmem:[%s2744_s26 + $0x368] sm:$0xff] }
  0x3f   : > { %v478_v24 = vld [vmem:[%s2744_s26 + $0x380] sm:$0xff]  ;;  %475 = vst [vmem:[%s2749_s10 + $0x1b0] sm:$0xff] %v474_v22  ;;  %477 = vst [vmem:[%s2749_s10 + $0x1b8] sm:$0xff] %v476_v23  ;;  %v480_v25 = vld [vmem:[%s2744_s26 + $0x388] sm:$0xff] }
  0x40   : > { %479 = vst [vmem:[%s2749_s10 + $0x1c0] sm:$0xff] %v478_v24  ;;  %v482_v26 = vld [vmem:[%s2744_s26 + $0x3a0] sm:$0xff]  ;;  %v484_v27 = vld [vmem:[%s2744_s26 + $0x3a8] sm:$0xff]  ;;  %481 = vst [vmem:[%s2749_s10 + $0x1c8] sm:$0xff] %v480_v25 }
  0x41   : > { %483 = vst [vmem:[%s2749_s10 + $0x1d0] sm:$0xff] %v482_v26  ;;  %485 = vst [vmem:[%s2749_s10 + $0x1d8] sm:$0xff] %v484_v27  ;;  %v486_v28 = vld [vmem:[%s2744_s26 + $0x3c0] sm:$0xff]  ;;  %v488_v29 = vld [vmem:[%s2744_s26 + $0x3c8] sm:$0xff] }
  0x42   : > { %v490_v30 = vld [vmem:[%s2744_s26 + $0x3e0] sm:$0xff]  ;;  %487 = vst [vmem:[%s2749_s10 + $0x1e0] sm:$0xff] %v486_v28  ;;  %489 = vst [vmem:[%s2749_s10 + $0x1e8] sm:$0xff] %v488_v29  ;;  %v492_v31 = vld [vmem:[%s2744_s26 + $0x3e8] sm:$0xff] }
  0x43   : > { %491 = vst [vmem:[%s2749_s10 + $0x1f0] sm:$0xff] %v490_v30  ;;  %v494_v32 = vld [vmem:[%s2744_s26 + $0x400] sm:$0xff]  ;;  %v496_v33 = vld [vmem:[%s2744_s26 + $0x408] sm:$0xff]  ;;  %493 = vst [vmem:[%s2749_s10 + $0x1f8] sm:$0xff] %v492_v31 }
  0x44   : > { %495 = vst [vmem:[%s2749_s10 + $0x200] sm:$0xff] %v494_v32  ;;  %497 = vst [vmem:[%s2749_s10 + $0x208] sm:$0xff] %v496_v33  ;;  %v498_v34 = vld [vmem:[%s2744_s26 + $0x420] sm:$0xff]  ;;  %v500_v35 = vld [vmem:[%s2744_s26 + $0x428] sm:$0xff] }
  0x45   : > { %v502_v36 = vld [vmem:[%s2744_s26 + $0x440] sm:$0xff]  ;;  %499 = vst [vmem:[%s2749_s10 + $0x210] sm:$0xff] %v498_v34  ;;  %501 = vst [vmem:[%s2749_s10 + $0x218] sm:$0xff] %v500_v35  ;;  %v504_v37 = vld [vmem:[%s2744_s26 + $0x448] sm:$0xff] }
  0x46   : > { %503 = vst [vmem:[%s2749_s10 + $0x220] sm:$0xff] %v502_v36  ;;  %v506_v38 = vld [vmem:[%s2744_s26 + $0x460] sm:$0xff]  ;;  %v508_v39 = vld [vmem:[%s2744_s26 + $0x468] sm:$0xff]  ;;  %505 = vst [vmem:[%s2749_s10 + $0x228] sm:$0xff] %v504_v37 }
  0x47   : > { %507 = vst [vmem:[%s2749_s10 + $0x230] sm:$0xff] %v506_v38  ;;  %509 = vst [vmem:[%s2749_s10 + $0x238] sm:$0xff] %v508_v39  ;;  %v510_v40 = vld [vmem:[%s2744_s26 + $0x480] sm:$0xff]  ;;  %v512_v41 = vld [vmem:[%s2744_s26 + $0x488] sm:$0xff] }
  0x48   : > { %v514_v42 = vld [vmem:[%s2744_s26 + $0x4a0] sm:$0xff]  ;;  %511 = vst [vmem:[%s2749_s10 + $0x240] sm:$0xff] %v510_v40  ;;  %513 = vst [vmem:[%s2749_s10 + $0x248] sm:$0xff] %v512_v41  ;;  %v516_v43 = vld [vmem:[%s2744_s26 + $0x4a8] sm:$0xff] }
  0x49   : > { %515 = vst [vmem:[%s2749_s10 + $0x250] sm:$0xff] %v514_v42  ;;  %v518_v44 = vld [vmem:[%s2744_s26 + $0x4c0] sm:$0xff]  ;;  %v520_v45 = vld [vmem:[%s2744_s26 + $0x4c8] sm:$0xff]  ;;  %517 = vst [vmem:[%s2749_s10 + $0x258] sm:$0xff] %v516_v43 }
  0x4a   : > { %519 = vst [vmem:[%s2749_s10 + $0x260] sm:$0xff] %v518_v44  ;;  %521 = vst [vmem:[%s2749_s10 + $0x268] sm:$0xff] %v520_v45  ;;  %v522_v46 = vld [vmem:[%s2744_s26 + $0x4e0] sm:$0xff]  ;;  %v524_v47 = vld [vmem:[%s2744_s26 + $0x4e8] sm:$0xff] }
  0x4b   : > { %v526_v48 = vld [vmem:[%s2744_s26 + $0x500] sm:$0xff]  ;;  %523 = vst [vmem:[%s2749_s10 + $0x270] sm:$0xff] %v522_v46  ;;  %525 = vst [vmem:[%s2749_s10 + $0x278] sm:$0xff] %v524_v47  ;;  %v528_v49 = vld [vmem:[%s2744_s26 + $0x508] sm:$0xff] }
  0x4c   : > { %527 = vst [vmem:[%s2749_s10 + $0x280] sm:$0xff] %v526_v48  ;;  %v530_v50 = vld [vmem:[%s2744_s26 + $0x520] sm:$0xff]  ;;  %v532_v51 = vld [vmem:[%s2744_s26 + $0x528] sm:$0xff]  ;;  %529 = vst [vmem:[%s2749_s10 + $0x288] sm:$0xff] %v528_v49 }
  0x4d   : > { %531 = vst [vmem:[%s2749_s10 + $0x290] sm:$0xff] %v530_v50  ;;  %533 = vst [vmem:[%s2749_s10 + $0x298] sm:$0xff] %v532_v51  ;;  %v534_v52 = vld [vmem:[%s2744_s26 + $0x540] sm:$0xff]  ;;  %v536_v53 = vld [vmem:[%s2744_s26 + $0x548] sm:$0xff] }
  0x4e   : > { %v538_v54 = vld [vmem:[%s2744_s26 + $0x560] sm:$0xff]  ;;  %535 = vst [vmem:[%s2749_s10 + $0x2a0] sm:$0xff] %v534_v52  ;;  %537 = vst [vmem:[%s2749_s10 + $0x2a8] sm:$0xff] %v536_v53  ;;  %v540_v55 = vld [vmem:[%s2744_s26 + $0x568] sm:$0xff] }
  0x4f   : > { %539 = vst [vmem:[%s2749_s10 + $0x2b0] sm:$0xff] %v538_v54  ;;  %v542_v56 = vld [vmem:[%s2744_s26 + $0x580] sm:$0xff]  ;;  %v544_v57 = vld [vmem:[%s2744_s26 + $0x588] sm:$0xff]  ;;  %541 = vst [vmem:[%s2749_s10 + $0x2b8] sm:$0xff] %v540_v55 }
  0x50   : > { %543 = vst [vmem:[%s2749_s10 + $0x2c0] sm:$0xff] %v542_v56  ;;  %545 = vst [vmem:[%s2749_s10 + $0x2c8] sm:$0xff] %v544_v57  ;;  %v546_v58 = vld [vmem:[%s2744_s26 + $0x5a0] sm:$0xff]  ;;  %v548_v59 = vld [vmem:[%s2744_s26 + $0x5a8] sm:$0xff] }
  0x51   : > { %v550_v60 = vld [vmem:[%s2744_s26 + $0x5c0] sm:$0xff]  ;;  %547 = vst [vmem:[%s2749_s10 + $0x2d0] sm:$0xff] %v546_v58  ;;  %549 = vst [vmem:[%s2749_s10 + $0x2d8] sm:$0xff] %v548_v59  ;;  %v552_v61 = vld [vmem:[%s2744_s26 + $0x5c8] sm:$0xff] }
  0x52   : > { %551 = vst [vmem:[%s2749_s10 + $0x2e0] sm:$0xff] %v550_v60  ;;  %v554_v62 = vld [vmem:[%s2744_s26 + $0x5e0] sm:$0xff]  ;;  %v556_v63 = vld [vmem:[%s2744_s26 + $0x5e8] sm:$0xff]  ;;  %553 = vst [vmem:[%s2749_s10 + $0x2e8] sm:$0xff] %v552_v61 }
  0x53   : > { %555 = vst [vmem:[%s2749_s10 + $0x2f0] sm:$0xff] %v554_v62  ;;  %557 = vst [vmem:[%s2749_s10 + $0x2f8] sm:$0xff] %v556_v63  ;;  %v558_v0 = vld [vmem:[%s2744_s26 + $0x600] sm:$0xff]  ;;  %v560_v1 = vld [vmem:[%s2744_s26 + $0x608] sm:$0xff] }
  0x54   : > { %v562_v2 = vld [vmem:[%s2744_s26 + $0x620] sm:$0xff]  ;;  %559 = vst [vmem:[%s2749_s10 + $0x300] sm:$0xff] %v558_v0  ;;  %561 = vst [vmem:[%s2749_s10 + $0x308] sm:$0xff] %v560_v1  ;;  %v564_v3 = vld [vmem:[%s2744_s26 + $0x628] sm:$0xff] }
  0x55   : > { %563 = vst [vmem:[%s2749_s10 + $0x310] sm:$0xff] %v562_v2  ;;  %v566_v4 = vld [vmem:[%s2744_s26 + $0x640] sm:$0xff]  ;;  %v568_v5 = vld [vmem:[%s2744_s26 + $0x648] sm:$0xff]  ;;  %565 = vst [vmem:[%s2749_s10 + $0x318] sm:$0xff] %v564_v3 }
  0x56   : > { %567 = vst [vmem:[%s2749_s10 + $0x320] sm:$0xff] %v566_v4  ;;  %569 = vst [vmem:[%s2749_s10 + $0x328] sm:$0xff] %v568_v5  ;;  %v570_v6 = vld [vmem:[%s2744_s26 + $0x660] sm:$0xff]  ;;  %v572_v7 = vld [vmem:[%s2744_s26 + $0x668] sm:$0xff] }
  0x57   : > { %v574_v8 = vld [vmem:[%s2744_s26 + $0x680] sm:$0xff]  ;;  %571 = vst [vmem:[%s2749_s10 + $0x330] sm:$0xff] %v570_v6  ;;  %573 = vst [vmem:[%s2749_s10 + $0x338] sm:$0xff] %v572_v7  ;;  %v576_v9 = vld [vmem:[%s2744_s26 + $0x688] sm:$0xff] }
  0x58   : > { %575 = vst [vmem:[%s2749_s10 + $0x340] sm:$0xff] %v574_v8  ;;  %v578_v10 = vld [vmem:[%s2744_s26 + $0x6a0] sm:$0xff]  ;;  %v580_v11 = vld [vmem:[%s2744_s26 + $0x6a8] sm:$0xff]  ;;  %577 = vst [vmem:[%s2749_s10 + $0x348] sm:$0xff] %v576_v9 }
  0x59   : > { %579 = vst [vmem:[%s2749_s10 + $0x350] sm:$0xff] %v578_v10  ;;  %581 = vst [vmem:[%s2749_s10 + $0x358] sm:$0xff] %v580_v11  ;;  %v582_v12 = vld [vmem:[%s2744_s26 + $0x6c0] sm:$0xff]  ;;  %v584_v13 = vld [vmem:[%s2744_s26 + $0x6c8] sm:$0xff] }
  0x5a   : > { %v586_v14 = vld [vmem:[%s2744_s26 + $0x6e0] sm:$0xff]  ;;  %583 = vst [vmem:[%s2749_s10 + $0x360] sm:$0xff] %v582_v12  ;;  %585 = vst [vmem:[%s2749_s10 + $0x368] sm:$0xff] %v584_v13  ;;  %v588_v15 = vld [vmem:[%s2744_s26 + $0x6e8] sm:$0xff] }
  0x5b   : > { %587 = vst [vmem:[%s2749_s10 + $0x370] sm:$0xff] %v586_v14  ;;  %v590_v16 = vld [vmem:[%s2744_s26 + $0x700] sm:$0xff]  ;;  %v592_v17 = vld [vmem:[%s2744_s26 + $0x708] sm:$0xff]  ;;  %589 = vst [vmem:[%s2749_s10 + $0x378] sm:$0xff] %v588_v15 }
  0x5c   : > { %591 = vst [vmem:[%s2749_s10 + $0x380] sm:$0xff] %v590_v16  ;;  %593 = vst [vmem:[%s2749_s10 + $0x388] sm:$0xff] %v592_v17  ;;  %v594_v18 = vld [vmem:[%s2744_s26 + $0x720] sm:$0xff]  ;;  %v596_v19 = vld [vmem:[%s2744_s26 + $0x728] sm:$0xff] }
  0x5d   : > { %v598_v20 = vld [vmem:[%s2744_s26 + $0x740] sm:$0xff]  ;;  %595 = vst [vmem:[%s2749_s10 + $0x390] sm:$0xff] %v594_v18  ;;  %597 = vst [vmem:[%s2749_s10 + $0x398] sm:$0xff] %v596_v19  ;;  %v600_v21 = vld [vmem:[%s2744_s26 + $0x748] sm:$0xff] }
  0x5e   : > { %599 = vst [vmem:[%s2749_s10 + $0x3a0] sm:$0xff] %v598_v20  ;;  %v602_v22 = vld [vmem:[%s2744_s26 + $0x760] sm:$0xff]  ;;  %v604_v23 = vld [vmem:[%s2744_s26 + $0x768] sm:$0xff]  ;;  %601 = vst [vmem:[%s2749_s10 + $0x3a8] sm:$0xff] %v600_v21 }
  0x5f   : > { %603 = vst [vmem:[%s2749_s10 + $0x3b0] sm:$0xff] %v602_v22  ;;  %605 = vst [vmem:[%s2749_s10 + $0x3b8] sm:$0xff] %v604_v23  ;;  %v606_v24 = vld [vmem:[%s2744_s26 + $0x780] sm:$0xff]  ;;  %v608_v25 = vld [vmem:[%s2744_s26 + $0x788] sm:$0xff] }
  0x60   : > { %v610_v26 = vld [vmem:[%s2744_s26 + $0x7a0] sm:$0xff]  ;;  %607 = vst [vmem:[%s2749_s10 + $0x3c0] sm:$0xff] %v606_v24  ;;  %609 = vst [vmem:[%s2749_s10 + $0x3c8] sm:$0xff] %v608_v25  ;;  %v612_v27 = vld [vmem:[%s2744_s26 + $0x7a8] sm:$0xff] }
  0x61   : > { %611 = vst [vmem:[%s2749_s10 + $0x3d0] sm:$0xff] %v610_v26  ;;  %v614_v28 = vld [vmem:[%s2744_s26 + $0x7c0] sm:$0xff]  ;;  %v616_v29 = vld [vmem:[%s2744_s26 + $0x7c8] sm:$0xff]  ;;  %613 = vst [vmem:[%s2749_s10 + $0x3d8] sm:$0xff] %v612_v27 }
  0x62   : > { %615 = vst [vmem:[%s2749_s10 + $0x3e0] sm:$0xff] %v614_v28  ;;  %617 = vst [vmem:[%s2749_s10 + $0x3e8] sm:$0xff] %v616_v29  ;;  %v618_v30 = vld [vmem:[%s2744_s26 + $0x7e0] sm:$0xff]  ;;  %v620_v31 = vld [vmem:[%s2744_s26 + $0x7e8] sm:$0xff] }
  0x63   : > { %619 = vst [vmem:[%s2749_s10 + $0x3f0] sm:$0xff] %v618_v30  ;;  %621 = vst [vmem:[%s2749_s10 + $0x3f8] sm:$0xff] %v620_v31 }
  0x64 PF: > { %p2103_p5 = scmp.ge.s32.totalorder %s2581_s29, 1  ;;  %p626_p6 = scmp.lt.s32.totalorder %s2581_s29, 3 }
  0x66   : > { %p627_p7 = pnand %p2103_p5, %p626_p6 }
  0x67   : > { %s633_s11 = sand.u32 (!%p627_p7), 1, %s2573_s27   ;;  %s2106_s17 = sshll.u32 (!%p627_p7), %s2093_s30, 2 }
  0x68   : > { %630 = sbr.rel (%p627_p7) target bundleno = 937 (0x3a9), region = 90  ;;  %s2104_s13 = sshll.u32 (!%p627_p7), %s633_s11, 8 }
  0x69   : > { %s3009_s14 = scalar_lea.vmem (!%p627_p7), [#allocation2], %s2104_s13  ;;  %s2105_s15 = sshll.u32 (!%p627_p7), %s633_s11, 10 }
  0x6a   : > { %s3039_s16 = scalar_lea.vmem (!%p627_p7), [#allocation3], %s2105_s15  ;;  %p680_p8 = scmp.lt.s32.totalorder (!%p627_p7), %s2106_s17, 7 }
  0x6d   : > { %v2583_v32 = vmov 0   ;;  %v2307_v33 = vld [vmem:[%s3009_s14 + $0xe4] ss:$16 sps:$4 sm:$0xff]   ;;  %v2309_v34 = vld [vmem:[%s3009_s14 + $0xec] ss:$16 sps:$4 sm:$0xff]   ;;  %vm974_vm0 = vcmask 130048  }
  0x6e   : > { %911 = vmatprep.mubr.bf16.mxu0 %v2583_v32  ;;  %952 = vmatprep.mubr.bf16.mxu1 %v2583_v32  ;;  %v2311_v35 = vld [vmem:[%s3009_s14 + $0xe0] ss:$16 sps:$4 sm:$0xff]   ;;  %v2312_v36 = vld [vmem:[%s3009_s14 + $0xe8] ss:$16 sps:$4 sm:$0xff]   ;;  %v2313_v37 = vld [vmem:[%s3009_s14 + $0xc4] ss:$16 sps:$4 sm:$0xff]  }
  0x6f   : > { %2305 = vset.pattern.permute.xlu0 %v2583_v32  ;;  %2306 = vset.pattern.permute.xlu1 %v2583_v32  ;;  %v2315_v38 = vld [vmem:[%s3009_s14 + $0xcc] ss:$16 sps:$4 sm:$0xff]   ;;  %v2317_v39 = vld [vmem:[%s3009_s14 + $0xc0] ss:$16 sps:$4 sm:$0xff]   ;;  %v2318_v40 = vld [vmem:[%s3009_s14 + $0xc8] ss:$16 sps:$4 sm:$0xff]  }
  0x70   : > { %879 = vmatprep.subr.bf16.mxu0 %v2307_v33  ;;  %920 = vmatprep.subr.bf16.mxu1 %v2309_v34  ;;  %v2319_v41 = vld [vmem:[%s3009_s14 + $0xa4] ss:$16 sps:$4 sm:$0xff]   ;;  %v2321_v42 = vld [vmem:[%s3009_s14 + $0xac] ss:$16 sps:$4 sm:$0xff]   ;;  %v2323_v43 = vld [vmem:[%s3009_s14 + $0xa0] ss:$16 sps:$4 sm:$0xff]  }
  0x71   : > { %880 = vmatpush1.bf16.msra.mxu0 %v2311_v35  ;;  %921 = vmatpush1.bf16.msra.mxu1 %v2312_v36  ;;  %v2324_v44 = vld [vmem:[%s3009_s14 + $0xa8] ss:$16 sps:$4 sm:$0xff]   ;;  %v2325_v45 = vld [vmem:[%s3009_s14 + $0x84] ss:$16 sps:$4 sm:$0xff]   ;;  %v2327_v46 = vld [vmem:[%s3009_s14 + $0x8c] ss:$16 sps:$4 sm:$0xff]  }
  0x72   : > { %881 = vmatprep.subr.bf16.mxu0 %v2313_v37  ;;  %922 = vmatprep.subr.bf16.mxu1 %v2315_v38  ;;  %v2329_v47 = vld [vmem:[%s3009_s14 + $0x80] ss:$16 sps:$4 sm:$0xff]   ;;  %v2330_v48 = vld [vmem:[%s3009_s14 + $0x88] ss:$16 sps:$4 sm:$0xff]   ;;  %v2331_v49 = vld [vmem:[%s3009_s14 + $0x64] ss:$16 sps:$4 sm:$0xff]  }
  0x73   : > { %v2333_v50 = vld [vmem:[%s3009_s14 + $0x6c] ss:$16 sps:$4 sm:$0xff]   ;;  %v2335_v51 = vld [vmem:[%s3009_s14 + $0x60] ss:$16 sps:$4 sm:$0xff]   ;;  %v2336_v52 = vld [vmem:[%s3009_s14 + $0x68] ss:$16 sps:$4 sm:$0xff]  }
  0x74   : > { %v2337_v53 = vld [vmem:[%s3009_s14 + $0x44] ss:$16 sps:$4 sm:$0xff]   ;;  %v2339_v54 = vld [vmem:[%s3009_s14 + $0x4c] ss:$16 sps:$4 sm:$0xff]   ;;  %v2341_v55 = vld [vmem:[%s3009_s14 + $0x40] ss:$16 sps:$4 sm:$0xff]  }
  0x75   : > { %882 = vmatpush1.bf16.msra.mxu0 %v2317_v39  ;;  %923 = vmatpush1.bf16.msra.mxu1 %v2318_v40  ;;  %v2342_v56 = vld [vmem:[%s3009_s14 + $0x48] ss:$16 sps:$4 sm:$0xff]   ;;  %v2343_v57 = vld [vmem:[%s3009_s14 + $0x24] ss:$16 sps:$4 sm:$0xff]   ;;  %v2345_v58 = vld [vmem:[%s3009_s14 + $0x2c] ss:$16 sps:$4 sm:$0xff]  }
  0x76   : > { %883 = vmatprep.subr.bf16.mxu0 %v2319_v41  ;;  %924 = vmatprep.subr.bf16.mxu1 %v2321_v42  ;;  %v2347_v59 = vld [vmem:[%s3009_s14 + $0x20] ss:$16 sps:$4 sm:$0xff]   ;;  %v2348_v60 = vld [vmem:[%s3009_s14 + $0x28] ss:$16 sps:$4 sm:$0xff]   ;;  %v2349_v61 = vld [vmem:[%s3009_s14 + $0x4] ss:$16 sps:$4 sm:$0xff]  }
  0x77   : > { %v2351_v62 = vld [vmem:[%s3009_s14 + $0xc] ss:$16 sps:$4 sm:$0xff]   ;;  %v2353_v63 = vld [vmem:[%s3009_s14] ss:$16 sps:$4 sm:$0xff]   ;;  %v2354_v0 = vld [vmem:[%s3009_s14 + $0x8] ss:$16 sps:$4 sm:$0xff]  }
  0x78   : > { %v2357_v1 = vld [vmem:[%s3039_s16 + $0xe4] ss:$16 sps:$4 sm:$0xff]   ;;  %v686_v3 = vld [vmem:[%s3307_s2] sm:$0xf]  ;;  %v3060_v5 = vld [vmem:[%s3308_s3 + $0x8] sm:$0xff]  ;;  %s3319_s17 = smov (!%p680_p8, %s2106_s17), 7 }
  0x79   : > { %884 = vmatpush1.bf16.msra.mxu0 %v2323_v43  ;;  %925 = vmatpush1.bf16.msra.mxu1 %v2324_v44  ;;  %v2360_v2 = vld [vmem:[%s3039_s16 + $0x2e4] ss:$16 sps:$4 sm:$0xff]   ;;  %v2355_v6 = vld [vmem:[%s3039_s16 + $0xe0] ss:$16 sps:$4 sm:$0xff]   ;;  %v3072_v11 = vcombine.high %v3060_v5, %v3060_v5  ;;  %s2107_s18 = sshll.u32 %s3319_s17, 3 }
  0x7a   : > { %885 = vmatprep.subr.bf16.mxu0 %v2325_v45  ;;  %926 = vmatprep.subr.bf16.mxu1 %v2327_v46  ;;  %v3055_v4 = vld [vmem:[%s3308_s3] sm:$0xff]  ;;  %s683_s19 = scalar_lea.vmem %s3313_s8, %s2107_s18 }
  0x7b   : > { %v2358_v7 = vld [vmem:[%s3039_s16 + $0x2e0] ss:$16 sps:$4 sm:$0xff]   ;;  %v2363_v8 = vld [vmem:[%s3039_s16 + $0xc4] ss:$16 sps:$4 sm:$0xff]   ;;  %v3068_v10 = vcombine.high %v3055_v4, %v3055_v4 }
  0x7c   : > { %v2366_v9 = vld [vmem:[%s3039_s16 + $0x2c4] ss:$16 sps:$4 sm:$0xff]   ;;  %v2361_v12 = vld [vmem:[%s3039_s16 + $0xc0] ss:$16 sps:$4 sm:$0xff]  }
  0x7d   : > { %886 = vmatpush1.bf16.msra.mxu0 %v2329_v47  ;;  %927 = vmatpush1.bf16.msra.mxu1 %v2330_v48  ;;  %v2364_v13 = vld [vmem:[%s3039_s16 + $0x2c0] ss:$16 sps:$4 sm:$0xff]   ;;  %v2369_v14 = vld [vmem:[%s3039_s16 + $0xa4] ss:$16 sps:$4 sm:$0xff]  }
  0x7e   : > { %887 = vmatprep.subr.bf16.mxu0 %v2331_v49  ;;  %928 = vmatprep.subr.bf16.mxu1 %v2333_v50  ;;  %v2372_v15 = vld [vmem:[%s3039_s16 + $0x2a4] ss:$16 sps:$4 sm:$0xff]   ;;  %v2367_v16 = vld [vmem:[%s3039_s16 + $0xa0] ss:$16 sps:$4 sm:$0xff]  }
  0x7f   : > { %v2370_v17 = vld [vmem:[%s3039_s16 + $0x2a0] ss:$16 sps:$4 sm:$0xff]   ;;  %v2375_v18 = vld [vmem:[%s3039_s16 + $0x84] ss:$16 sps:$4 sm:$0xff]  }
  0x80   : > { %v2378_v19 = vld [vmem:[%s3039_s16 + $0x284] ss:$16 sps:$4 sm:$0xff]   ;;  %v2373_v20 = vld [vmem:[%s3039_s16 + $0x80] ss:$16 sps:$4 sm:$0xff]  }
  0x81   : > { %888 = vmatpush1.bf16.msra.mxu0 %v2335_v51  ;;  %929 = vmatpush1.bf16.msra.mxu1 %v2336_v52  ;;  %v2376_v21 = vld [vmem:[%s3039_s16 + $0x280] ss:$16 sps:$4 sm:$0xff]   ;;  %v2381_v22 = vld [vmem:[%s3039_s16 + $0x64] ss:$16 sps:$4 sm:$0xff]  }
  0x82   : > { %889 = vmatprep.subr.bf16.mxu0 %v2337_v53  ;;  %930 = vmatprep.subr.bf16.mxu1 %v2339_v54  ;;  %v2384_v23 = vld [vmem:[%s3039_s16 + $0x264] ss:$16 sps:$4 sm:$0xff]   ;;  %v2379_v24 = vld [vmem:[%s3039_s16 + $0x60] ss:$16 sps:$4 sm:$0xff]  }
  0x83   : > { %v2382_v25 = vld [vmem:[%s3039_s16 + $0x260] ss:$16 sps:$4 sm:$0xff]   ;;  %v2387_v26 = vld [vmem:[%s3039_s16 + $0x44] ss:$16 sps:$4 sm:$0xff]  }
  0x84   : > { %v2390_v27 = vld [vmem:[%s3039_s16 + $0x244] ss:$16 sps:$4 sm:$0xff]   ;;  %v2385_v28 = vld [vmem:[%s3039_s16 + $0x40] ss:$16 sps:$4 sm:$0xff]  }
  0x85   : > { %890 = vmatpush1.bf16.msra.mxu0 %v2341_v55  ;;  %931 = vmatpush1.bf16.msra.mxu1 %v2342_v56  ;;  %v2388_v29 = vld [vmem:[%s3039_s16 + $0x240] ss:$16 sps:$4 sm:$0xff]   ;;  %v2393_v30 = vld [vmem:[%s3039_s16 + $0x24] ss:$16 sps:$4 sm:$0xff]  }
  0x86   : > { %891 = vmatprep.subr.bf16.mxu0 %v2343_v57  ;;  %932 = vmatprep.subr.bf16.mxu1 %v2345_v58  ;;  %v2396_v31 = vld [vmem:[%s3039_s16 + $0x224] ss:$16 sps:$4 sm:$0xff]   ;;  %v2391_v32 = vld [vmem:[%s3039_s16 + $0x20] ss:$16 sps:$4 sm:$0xff]  }
  0x87   : > { %v2394_v33 = vld [vmem:[%s3039_s16 + $0x220] ss:$16 sps:$4 sm:$0xff]   ;;  %v2399_v34 = vld [vmem:[%s3039_s16 + $0x4] ss:$16 sps:$4 sm:$0xff]  }
  0x88   : > { %v2402_v35 = vld [vmem:[%s3039_s16 + $0x204] ss:$16 sps:$4 sm:$0xff]   ;;  %v2397_v36 = vld [vmem:[%s3039_s16] ss:$16 sps:$4 sm:$0xff]  }
  0x89   : > { %892 = vmatpush1.bf16.msra.mxu0 %v2347_v59  ;;  %933 = vmatpush1.bf16.msra.mxu1 %v2348_v60  ;;  %v2400_v37 = vld [vmem:[%s3039_s16 + $0x200] ss:$16 sps:$4 sm:$0xff]   ;;  %v2405_v38 = vld [vmem:[%s3039_s16 + $0x1e4] ss:$16 sps:$4 sm:$0xff]  }
  0x8a   : > { %893 = vmatprep.subr.bf16.mxu0 %v2349_v61  ;;  %934 = vmatprep.subr.bf16.mxu1 %v2351_v62  ;;  %v2408_v39 = vld [vmem:[%s3039_s16 + $0x3e4] ss:$16 sps:$4 sm:$0xff]   ;;  %v2403_v40 = vld [vmem:[%s3039_s16 + $0x1e0] ss:$16 sps:$4 sm:$0xff]  }
  0x8b   : > { %v2406_v41 = vld [vmem:[%s3039_s16 + $0x3e0] ss:$16 sps:$4 sm:$0xff]   ;;  %v2411_v42 = vld [vmem:[%s3039_s16 + $0x1c4] ss:$16 sps:$4 sm:$0xff]  }
  0x8c   : > { %v2414_v43 = vld [vmem:[%s3039_s16 + $0x3c4] ss:$16 sps:$4 sm:$0xff]   ;;  %v2409_v44 = vld [vmem:[%s3039_s16 + $0x1c0] ss:$16 sps:$4 sm:$0xff]  }
  0x8d   : > { %894 = vmatpush1.bf16.msra.mxu0 %v2353_v63  ;;  %935 = vmatpush1.bf16.msra.mxu1 %v2354_v0  ;;  %v2412_v45 = vld [vmem:[%s3039_s16 + $0x3c0] ss:$16 sps:$4 sm:$0xff]   ;;  %v2417_v46 = vld [vmem:[%s3039_s16 + $0x1a4] ss:$16 sps:$4 sm:$0xff]  }
  0x8e   : > { %1794 = vmatprep.subr.bf16.mxu0 %v2357_v1  ;;  %1835 = vmatprep.subr.bf16.mxu1 %v2360_v2  ;;  %v2420_v47 = vld [vmem:[%s3039_s16 + $0x3a4] ss:$16 sps:$4 sm:$0xff]   ;;  %v2415_v48 = vld [vmem:[%s3039_s16 + $0x1a0] ss:$16 sps:$4 sm:$0xff]  }
  0x8f   : > { %v2418_v49 = vld [vmem:[%s3039_s16 + $0x3a0] ss:$16 sps:$4 sm:$0xff]   ;;  %v2423_v50 = vld [vmem:[%s3039_s16 + $0x184] ss:$16 sps:$4 sm:$0xff]  }
  0x90   : > { %912 = vmatmul.mubr.bf16.vlgmr.msra.gmra.mxu0 %v686_v3  ;;  %953 = vmatmul.mubr.bf16.vlgmr.msra.gmra.mxu1 %v686_v3  ;;  %v2426_v51 = vld [vmem:[%s3039_s16 + $0x384] ss:$16 sps:$4 sm:$0xff]   ;;  %v2421_v52 = vld [vmem:[%s3039_s16 + $0x180] ss:$16 sps:$4 sm:$0xff]  }
  0x91   : > { %1795 = vmatpush1.bf16.msra.mxu0 %v2355_v6  ;;  %1836 = vmatpush1.bf16.msra.mxu1 %v2358_v7  ;;  %v2424_v53 = vld [vmem:[%s3039_s16 + $0x380] ss:$16 sps:$4 sm:$0xff]   ;;  %v2429_v54 = vld [vmem:[%s3039_s16 + $0x164] ss:$16 sps:$4 sm:$0xff]  }
  0x92   : > { %1796 = vmatprep.subr.bf16.mxu0 %v2363_v8  ;;  %1837 = vmatprep.subr.bf16.mxu1 %v2366_v9  ;;  %v2432_v55 = vld [vmem:[%s3039_s16 + $0x364] ss:$16 sps:$4 sm:$0xff]   ;;  %v2427_v56 = vld [vmem:[%s3039_s16 + $0x160] ss:$16 sps:$4 sm:$0xff]   ;;  %v2457_v8 = vld [vmem:[%s3039_s16 + $0xec] ss:$16 sps:$4 sm:$0xff]  }
  0x93   : > { %1826 = vmatprep.mubr.bf16.mxu0 %v3068_v10  ;;  %1867 = vmatprep.mubr.bf16.mxu1 %v3072_v11  ;;  %v2430_v57 = vld [vmem:[%s3039_s16 + $0x360] ss:$16 sps:$4 sm:$0xff]   ;;  %v2435_v58 = vld [vmem:[%s3039_s16 + $0x144] ss:$16 sps:$4 sm:$0xff]   ;;  %v2460_v9 = vld [vmem:[%s3039_s16 + $0x2ec] ss:$16 sps:$4 sm:$0xff]  }
  0x94   : > { %v2438_v59 = vld [vmem:[%s3039_s16 + $0x344] ss:$16 sps:$4 sm:$0xff]   ;;  %v2433_v60 = vld [vmem:[%s3039_s16 + $0x140] ss:$16 sps:$4 sm:$0xff]  }
  0x95   : > { %1797 = vmatpush1.bf16.msra.mxu0 %v2361_v12  ;;  %1838 = vmatpush1.bf16.msra.mxu1 %v2364_v13  ;;  %v2436_v61 = vld [vmem:[%s3039_s16 + $0x340] ss:$16 sps:$4 sm:$0xff]   ;;  %v2441_v62 = vld [vmem:[%s3039_s16 + $0x124] ss:$16 sps:$4 sm:$0xff]   ;;  %v3138_v12 = vcombine.low %v3055_v4, %v3055_v4  ;;  %v3142_v13 = vcombine.low %v3060_v5, %v3060_v5  ;;  %v2461_v4 = vld [vmem:[%s3039_s16 + $0xc8] ss:$16 sps:$4 sm:$0xff]  }
  0x96   : > { %1798 = vmatprep.subr.bf16.mxu0 %v2369_v14  ;;  %1839 = vmatprep.subr.bf16.mxu1 %v2372_v15  ;;  %v2444_v63 = vld [vmem:[%s3039_s16 + $0x324] ss:$16 sps:$4 sm:$0xff]   ;;  %v2439_v0 = vld [vmem:[%s3039_s16 + $0x120] ss:$16 sps:$4 sm:$0xff]   ;;  %v2455_v14 = vld [vmem:[%s3039_s16 + $0xe8] ss:$16 sps:$4 sm:$0xff]  }
  0x97   : > { %v2442_v1 = vld [vmem:[%s3039_s16 + $0x320] ss:$16 sps:$4 sm:$0xff]   ;;  %v2447_v2 = vld [vmem:[%s3039_s16 + $0x104] ss:$16 sps:$4 sm:$0xff]   ;;  %v2458_v15 = vld [vmem:[%s3039_s16 + $0x2e8] ss:$16 sps:$4 sm:$0xff]  }
  0x98   : > { %v2450_v3 = vld [vmem:[%s3039_s16 + $0x304] ss:$16 sps:$4 sm:$0xff]   ;;  %v2445_v6 = vld [vmem:[%s3039_s16 + $0x100] ss:$16 sps:$4 sm:$0xff]   ;;  %v2469_v5 = vld [vmem:[%s3039_s16 + $0xac] ss:$16 sps:$4 sm:$0xff]  }
  0x99   : > { %1799 = vmatpush1.bf16.msra.mxu0 %v2367_v16  ;;  %1840 = vmatpush1.bf16.msra.mxu1 %v2370_v17  ;;  %v2448_v7 = vld [vmem:[%s3039_s16 + $0x300] ss:$16 sps:$4 sm:$0xff]   ;;  %v2463_v16 = vld [vmem:[%s3039_s16 + $0xcc] ss:$16 sps:$4 sm:$0xff]  }
  0x9a   : > { %1800 = vmatprep.subr.bf16.mxu0 %v2375_v18  ;;  %1841 = vmatprep.subr.bf16.mxu1 %v2378_v19  ;;  %v2466_v17 = vld [vmem:[%s3039_s16 + $0x2cc] ss:$16 sps:$4 sm:$0xff]   ;;  %v2464_v18 = vld [vmem:[%s3039_s16 + $0x2c8] ss:$16 sps:$4 sm:$0xff]  }
  0x9b   : > { %v2472_v19 = vld [vmem:[%s3039_s16 + $0x2ac] ss:$16 sps:$4 sm:$0xff]  }
  0x9d   : > { %1801 = vmatpush1.bf16.msra.mxu0 %v2373_v20  ;;  %1842 = vmatpush1.bf16.msra.mxu1 %v2376_v21  ;;  %v2467_v20 = vld [vmem:[%s3039_s16 + $0xa8] ss:$16 sps:$4 sm:$0xff]  }
  0x9e   : > { %1802 = vmatprep.subr.bf16.mxu0 %v2381_v22  ;;  %1843 = vmatprep.subr.bf16.mxu1 %v2384_v23  ;;  %v2470_v21 = vld [vmem:[%s3039_s16 + $0x2a8] ss:$16 sps:$4 sm:$0xff]   ;;  %v2475_v22 = vld [vmem:[%s3039_s16 + $0x8c] ss:$16 sps:$4 sm:$0xff]  }
  0x9f   : > { %v2478_v23 = vld [vmem:[%s3039_s16 + $0x28c] ss:$16 sps:$4 sm:$0xff]  }
  0xa1   : > { %1803 = vmatpush1.bf16.msra.mxu0 %v2379_v24  ;;  %1844 = vmatpush1.bf16.msra.mxu1 %v2382_v25  ;;  %v2473_v24 = vld [vmem:[%s3039_s16 + $0x88] ss:$16 sps:$4 sm:$0xff]   ;;  %v2484_v25 = vld [vmem:[%s3039_s16 + $0x26c] ss:$16 sps:$4 sm:$0xff]  }
  0xa2   : > { %1804 = vmatprep.subr.bf16.mxu0 %v2387_v26  ;;  %1845 = vmatprep.subr.bf16.mxu1 %v2390_v27  ;;  %v2479_v26 = vld [vmem:[%s3039_s16 + $0x68] ss:$16 sps:$4 sm:$0xff]  }
  0xa3   : > { %v2482_v27 = vld [vmem:[%s3039_s16 + $0x268] ss:$16 sps:$4 sm:$0xff]  }
  0xa5   : > { %1805 = vmatpush1.bf16.msra.mxu0 %v2385_v28  ;;  %1846 = vmatpush1.bf16.msra.mxu1 %v2388_v29  ;;  %v2487_v28 = vld [vmem:[%s3039_s16 + $0x4c] ss:$16 sps:$4 sm:$0xff]  }
  0xa6   : > { %1806 = vmatprep.subr.bf16.mxu0 %v2393_v30  ;;  %1847 = vmatprep.subr.bf16.mxu1 %v2396_v31  ;;  %v2490_v29 = vld [vmem:[%s3039_s16 + $0x24c] ss:$16 sps:$4 sm:$0xff]   ;;  %v2485_v30 = vld [vmem:[%s3039_s16 + $0x48] ss:$16 sps:$4 sm:$0xff]  }
  0xa7   : > { %v2488_v31 = vld [vmem:[%s3039_s16 + $0x248] ss:$16 sps:$4 sm:$0xff]  }
  0xa9   : > { %1807 = vmatpush1.bf16.msra.mxu0 %v2391_v32  ;;  %1848 = vmatpush1.bf16.msra.mxu1 %v2394_v33  ;;  %v2493_v32 = vld [vmem:[%s3039_s16 + $0x2c] ss:$16 sps:$4 sm:$0xff]  }
  0xaa   : > { %1808 = vmatprep.subr.bf16.mxu0 %v2399_v34  ;;  %1849 = vmatprep.subr.bf16.mxu1 %v2402_v35  ;;  %v2496_v33 = vld [vmem:[%s3039_s16 + $0x22c] ss:$16 sps:$4 sm:$0xff]   ;;  %v2491_v34 = vld [vmem:[%s3039_s16 + $0x28] ss:$16 sps:$4 sm:$0xff]  }
  0xab   : > { %v2494_v35 = vld [vmem:[%s3039_s16 + $0x228] ss:$16 sps:$4 sm:$0xff]  }
  0xad   : > { %1809 = vmatpush1.bf16.msra.mxu0 %v2397_v36  ;;  %1850 = vmatpush1.bf16.msra.mxu1 %v2400_v37  ;;  %v2499_v36 = vld [vmem:[%s3039_s16 + $0xc] ss:$16 sps:$4 sm:$0xff]  }
  0xae   : > { %1810 = vmatprep.subr.bf16.mxu0 %v2405_v38  ;;  %1851 = vmatprep.subr.bf16.mxu1 %v2408_v39  ;;  %v2502_v37 = vld [vmem:[%s3039_s16 + $0x20c] ss:$16 sps:$4 sm:$0xff]   ;;  %v2497_v38 = vld [vmem:[%s3039_s16 + $0x8] ss:$16 sps:$4 sm:$0xff]  }
  0xaf   : > { %v2500_v39 = vld [vmem:[%s3039_s16 + $0x208] ss:$16 sps:$4 sm:$0xff]  }
  0xb1   : > { %1811 = vmatpush2.bf16.msra.mxu0 %v2403_v40  ;;  %1852 = vmatpush2.bf16.msra.mxu1 %v2406_v41  ;;  %v2505_v40 = vld [vmem:[%s3039_s16 + $0x1ec] ss:$16 sps:$4 sm:$0xff]  }
  0xb2   : > { %1812 = vmatprep.subr.bf16.mxu0 %v2411_v42  ;;  %1853 = vmatprep.subr.bf16.mxu1 %v2414_v43  ;;  %v2508_v41 = vld [vmem:[%s3039_s16 + $0x3ec] ss:$16 sps:$4 sm:$0xff]   ;;  %v2503_v42 = vld [vmem:[%s3039_s16 + $0x1e8] ss:$16 sps:$4 sm:$0xff]  }
  0xb3   : > { %v2506_v43 = vld [vmem:[%s3039_s16 + $0x3e8] ss:$16 sps:$4 sm:$0xff]  }
  0xb5   : > { %1813 = vmatpush2.bf16.msra.mxu0 %v2409_v44  ;;  %1854 = vmatpush2.bf16.msra.mxu1 %v2412_v45  ;;  %v2511_v44 = vld [vmem:[%s3039_s16 + $0x1cc] ss:$16 sps:$4 sm:$0xff]  }
  0xb6   : > { %1814 = vmatprep.subr.bf16.mxu0 %v2417_v46  ;;  %1855 = vmatprep.subr.bf16.mxu1 %v2420_v47  ;;  %v2514_v45 = vld [vmem:[%s3039_s16 + $0x3cc] ss:$16 sps:$4 sm:$0xff]   ;;  %v2509_v46 = vld [vmem:[%s3039_s16 + $0x1c8] ss:$16 sps:$4 sm:$0xff]  }
  0xb7   : > { %v2512_v47 = vld [vmem:[%s3039_s16 + $0x3c8] ss:$16 sps:$4 sm:$0xff]  }
  0xb9   : > { %1815 = vmatpush2.bf16.msra.mxu0 %v2415_v48  ;;  %1856 = vmatpush2.bf16.msra.mxu1 %v2418_v49  ;;  %v2517_v48 = vld [vmem:[%s3039_s16 + $0x1ac] ss:$16 sps:$4 sm:$0xff]  }
  0xba   : > { %1816 = vmatprep.subr.bf16.mxu0 %v2423_v50  ;;  %1857 = vmatprep.subr.bf16.mxu1 %v2426_v51  ;;  %v2520_v49 = vld [vmem:[%s3039_s16 + $0x3ac] ss:$16 sps:$4 sm:$0xff]   ;;  %v2515_v50 = vld [vmem:[%s3039_s16 + $0x1a8] ss:$16 sps:$4 sm:$0xff]  }
  0xbb   : > { %v2518_v51 = vld [vmem:[%s3039_s16 + $0x3a8] ss:$16 sps:$4 sm:$0xff]  }
  0xbd   : > { %1817 = vmatpush2.bf16.msra.mxu0 %v2421_v52  ;;  %1858 = vmatpush2.bf16.msra.mxu1 %v2424_v53  ;;  %v2523_v52 = vld [vmem:[%s3039_s16 + $0x18c] ss:$16 sps:$4 sm:$0xff]  }
  0xbe   : > { %1818 = vmatprep.subr.bf16.mxu0 %v2429_v54  ;;  %1859 = vmatprep.subr.bf16.mxu1 %v2432_v55  ;;  %v2526_v53 = vld [vmem:[%s3039_s16 + $0x38c] ss:$16 sps:$4 sm:$0xff]   ;;  %v2521_v54 = vld [vmem:[%s3039_s16 + $0x188] ss:$16 sps:$4 sm:$0xff]  }
  0xbf   : > { %v2524_v55 = vld [vmem:[%s3039_s16 + $0x388] ss:$16 sps:$4 sm:$0xff]  }
  0xc1   : > { %1819 = vmatpush2.bf16.msra.mxu0 %v2427_v56  ;;  %1860 = vmatpush2.bf16.msra.mxu1 %v2430_v57  ;;  %v2529_v56 = vld [vmem:[%s3039_s16 + $0x16c] ss:$16 sps:$4 sm:$0xff]  }
  0xc2   : > { %1820 = vmatprep.subr.bf16.mxu0 %v2435_v58  ;;  %1861 = vmatprep.subr.bf16.mxu1 %v2438_v59  ;;  %v2532_v57 = vld [vmem:[%s3039_s16 + $0x36c] ss:$16 sps:$4 sm:$0xff]   ;;  %v2527_v58 = vld [vmem:[%s3039_s16 + $0x168] ss:$16 sps:$4 sm:$0xff]  }
  0xc3   : > { %v2530_v59 = vld [vmem:[%s3039_s16 + $0x368] ss:$16 sps:$4 sm:$0xff]  }
  0xc5   : > { %1821 = vmatpush2.bf16.msra.mxu0 %v2433_v60  ;;  %1862 = vmatpush2.bf16.msra.mxu1 %v2436_v61  ;;  %v2535_v60 = vld [vmem:[%s3039_s16 + $0x14c] ss:$16 sps:$4 sm:$0xff]  }
  0xc6   : > { %1822 = vmatprep.subr.bf16.mxu0 %v2441_v62  ;;  %1863 = vmatprep.subr.bf16.mxu1 %v2444_v63  ;;  %v2538_v61 = vld [vmem:[%s3039_s16 + $0x34c] ss:$16 sps:$4 sm:$0xff]   ;;  %v2533_v62 = vld [vmem:[%s3039_s16 + $0x148] ss:$16 sps:$4 sm:$0xff]  }
  0xc7   : > { %v2536_v63 = vld [vmem:[%s3039_s16 + $0x348] ss:$16 sps:$4 sm:$0xff]  }
  0xc9   : > { %1823 = vmatpush2.bf16.msra.mxu0 %v2439_v0  ;;  %1864 = vmatpush2.bf16.msra.mxu1 %v2442_v1  ;;  %v2541_v0 = vld [vmem:[%s3039_s16 + $0x12c] ss:$16 sps:$4 sm:$0xff]  }
  0xca   : > { %1824 = vmatprep.subr.bf16.mxu0 %v2447_v2  ;;  %1865 = vmatprep.subr.bf16.mxu1 %v2450_v3  ;;  %v2544_v1 = vld [vmem:[%s3039_s16 + $0x32c] ss:$16 sps:$4 sm:$0xff]   ;;  %v2539_v2 = vld [vmem:[%s3039_s16 + $0x128] ss:$16 sps:$4 sm:$0xff]  }
  0xcb   : > { %v2542_v3 = vld [vmem:[%s3039_s16 + $0x328] ss:$16 sps:$4 sm:$0xff]  }
  0xcd   : > { %1825 = vmatpush2.bf16.msra.mxu0 %v2445_v6  ;;  %1866 = vmatpush2.bf16.msra.mxu1 %v2448_v7  ;;  %v2547_v6 = vld [vmem:[%s3039_s16 + $0x10c] ss:$16 sps:$4 sm:$0xff]  }
  0xce   : > { %1876 = vmatprep.subr.bf16.mxu0 %v2457_v8  ;;  %1917 = vmatprep.subr.bf16.mxu1 %v2460_v9  ;;  %v2550_v7 = vld [vmem:[%s3039_s16 + $0x30c] ss:$16 sps:$4 sm:$0xff]   ;;  %v2545_v8 = vld [vmem:[%s3039_s16 + $0x108] ss:$16 sps:$4 sm:$0xff]  }
  0xcf   : > { %v2548_v9 = vld [vmem:[%s3039_s16 + $0x308] ss:$16 sps:$4 sm:$0xff]  }
  0xd0   : > { %1827 = vmatmul.mubr.bf16.vlgmr.msra.gmra.mxu0 %v3138_v12  ;;  %1868 = vmatmul.mubr.bf16.vlgmr.msra.gmra.mxu1 %v3142_v13 }
  0xd1   : > { %1877 = vmatpush1.bf16.msra.mxu0 %v2455_v14  ;;  %1918 = vmatpush1.bf16.msra.mxu1 %v2458_v15 }
  0xd2   : > { %1878 = vmatprep.subr.bf16.mxu0 %v2463_v16  ;;  %1919 = vmatprep.subr.bf16.mxu1 %v2466_v17 }
  0xd3   : > { %1908 = vmatprep.mubr.bf16.mxu0 %v3068_v10  ;;  %1949 = vmatprep.mubr.bf16.mxu1 %v3072_v11  ;;  %v2476_v10 = vld [vmem:[%s3039_s16 + $0x288] ss:$16 sps:$4 sm:$0xff]   ;;  %v2481_v11 = vld [vmem:[%s3039_s16 + $0x6c] ss:$16 sps:$4 sm:$0xff]  }
  0xd5   : > { %1879 = vmatpush1.bf16.msra.mxu0 %v2461_v4  ;;  %1920 = vmatpush1.bf16.msra.mxu1 %v2464_v18 }
  0xd6   : > { %1880 = vmatprep.subr.bf16.mxu0 %v2469_v5  ;;  %1921 = vmatprep.subr.bf16.mxu1 %v2472_v19 }
  0xd9   : > { %1881 = vmatpush1.bf16.msra.mxu0 %v2467_v20  ;;  %1922 = vmatpush1.bf16.msra.mxu1 %v2470_v21 }
  0xda   : > { %1882 = vmatprep.subr.bf16.mxu0 %v2475_v22  ;;  %1923 = vmatprep.subr.bf16.mxu1 %v2478_v23 }
  0xdd   : > { %1883 = vmatpush1.bf16.msra.mxu0 %v2473_v24  ;;  %1924 = vmatpush1.bf16.msra.mxu1 %v2476_v10 }
  0xde   : > { %1884 = vmatprep.subr.bf16.mxu0 %v2481_v11  ;;  %1925 = vmatprep.subr.bf16.mxu1 %v2484_v25 }
  0xe1   : > { %1885 = vmatpush1.bf16.msra.mxu0 %v2479_v26  ;;  %1926 = vmatpush1.bf16.msra.mxu1 %v2482_v27 }
  0xe2   : > { %1886 = vmatprep.subr.bf16.mxu0 %v2487_v28  ;;  %1927 = vmatprep.subr.bf16.mxu1 %v2490_v29 }
  0xe5   : > { %1887 = vmatpush1.bf16.msra.mxu0 %v2485_v30  ;;  %1928 = vmatpush1.bf16.msra.mxu1 %v2488_v31 }
  0xe6   : > { %1888 = vmatprep.subr.bf16.mxu0 %v2493_v32  ;;  %1929 = vmatprep.subr.bf16.mxu1 %v2496_v33 }
  0xe9   : > { %1889 = vmatpush1.bf16.msra.mxu0 %v2491_v34  ;;  %1930 = vmatpush1.bf16.msra.mxu1 %v2494_v35 }
  0xea   : > { %1890 = vmatprep.subr.bf16.mxu0 %v2499_v36  ;;  %1931 = vmatprep.subr.bf16.mxu1 %v2502_v37 }
  0xed   : > { %1891 = vmatpush1.bf16.msra.mxu0 %v2497_v38  ;;  %1932 = vmatpush1.bf16.msra.mxu1 %v2500_v39 }
  0xee   : > { %1892 = vmatprep.subr.bf16.mxu0 %v2505_v40  ;;  %1933 = vmatprep.subr.bf16.mxu1 %v2508_v41 }
  0xf1   : > { %1893 = vmatpush2.bf16.msra.mxu0 %v2503_v42  ;;  %1934 = vmatpush2.bf16.msra.mxu1 %v2506_v43 }
  0xf2   : > { %1894 = vmatprep.subr.bf16.mxu0 %v2511_v44  ;;  %1935 = vmatprep.subr.bf16.mxu1 %v2514_v45 }
  0xf5   : > { %1895 = vmatpush2.bf16.msra.mxu0 %v2509_v46  ;;  %1936 = vmatpush2.bf16.msra.mxu1 %v2512_v47 }
  0xf6   : > { %1896 = vmatprep.subr.bf16.mxu0 %v2517_v48  ;;  %1937 = vmatprep.subr.bf16.mxu1 %v2520_v49 }
  0xf9   : > { %1897 = vmatpush2.bf16.msra.mxu0 %v2515_v50  ;;  %1938 = vmatpush2.bf16.msra.mxu1 %v2518_v51  ;;  %v972_v50 = vld [vmem:[%s3309_s4] sm:$0xff] }
  0xfa   : > { %1898 = vmatprep.subr.bf16.mxu0 %v2523_v52  ;;  %1939 = vmatprep.subr.bf16.mxu1 %v2526_v53 }
  0xfd   : > { %1899 = vmatpush2.bf16.msra.mxu0 %v2521_v54  ;;  %1940 = vmatpush2.bf16.msra.mxu1 %v2524_v55 }
  0xfe   : > { %1900 = vmatprep.subr.bf16.mxu0 %v2529_v56  ;;  %1941 = vmatprep.subr.bf16.mxu1 %v2532_v57  ;;  %v985_v57 = vlaneseq }
 0x101   : > { %1901 = vmatpush2.bf16.msra.mxu0 %v2527_v58  ;;  %1942 = vmatpush2.bf16.msra.mxu1 %v2530_v59 }
 0x102   : > { %1902 = vmatprep.subr.bf16.mxu0 %v2535_v60  ;;  %1943 = vmatprep.subr.bf16.mxu1 %v2538_v61  ;;  %v986_v60 = vshrl.u32 %v985_v57, 7 }
 0x105   : > { %1903 = vmatpush2.bf16.msra.mxu0 %v2533_v62  ;;  %1944 = vmatpush2.bf16.msra.mxu1 %v2536_v63  ;;  %v982_v62 = vld [vmem:[%s3310_s5] sm:$0x1] }
 0x106   : > { %1904 = vmatprep.subr.bf16.mxu0 %v2541_v0  ;;  %1945 = vmatprep.subr.bf16.mxu1 %v2544_v1  ;;  %v987_v0 = vsub.s32 0, %v986_v60 }
 0x109   : > { %1905 = vmatpush2.bf16.msra.mxu0 %v2539_v2  ;;  %1946 = vmatpush2.bf16.msra.mxu1 %v2542_v3  ;;  %v984_v2 = vld [vmem:[%s3311_s6] sm:$0xff] }
 0x10a   : > { %1906 = vmatprep.subr.bf16.mxu0 %v2547_v6  ;;  %1947 = vmatprep.subr.bf16.mxu1 %v2550_v7 }
 0x10d   : > { %1907 = vmatpush2.bf16.msra.mxu0 %v2545_v8  ;;  %1948 = vmatpush2.bf16.msra.mxu1 %v2548_v9  ;;  %v2273_v8 = vld [vmem:[%s3309_s4 + $0x8] sm:$0xff] }
 0x110   : > { %1909 = vmatmul.mubr.bf16.vlgmr.msra.gmra.mxu0 %v3138_v12  ;;  %1950 = vmatmul.mubr.bf16.vlgmr.msra.gmra.mxu1 %v3142_v13 }
 0x150   : > { %v3212_v14 = vpop.f32.mrf.mxu0  ;;  %v3214_v15 = vpop.f32.mrf.mxu1 }
 0x151   : > { %v961_v16 = vmax.f32 %v3212_v14, 0.0  ;;  %v963_v20 = vmax.f32 %v3214_v15, 0.0 }
 0x152   : > { %v3217_v17 = vpop.f32.mrf.mxu0  ;;  %v3219_v4 = vpop.f32.mrf.mxu1 }
 0x153   : > { %v962_v18 = vmax.f32 %v3217_v17, 0.0  ;;  %v964_v22 = vmax.f32 %v3219_v4, 0.0 }
 0x154   : > { %v917_v5 = vpop.f32.mrf.mxu0  ;;  %v958_v19 = vpop.f32.mrf.mxu1 }
 0x155   : > { %v965_v12 = vadd.f32 %v962_v18, %v961_v16 }
 0x156   : > { %v918_v13 = vpop.f32.mrf.mxu0  ;;  %v959_v21 = vpop.f32.mrf.mxu1 }
 0x157   : > { %v966_v23 = vadd.f32 %v965_v12, %v963_v20 }
 0x159   : > { %v967_v24 = vadd.f32 %v966_v23, %v964_v22 }
 0x15b   : > { %968 = vadd.xlane.f32.xlu0 %v967_v24 }
 0x190   : > { %v1828_v10 = vpop.f32.mrf.mxu0  ;;  %v1869_v11 = vpop.f32.mrf.mxu1 }
 0x191   : > { %v3232_v31 = vadd.f32 %v1869_v11, %v1828_v10  ;;  %v2274_v11 = vld [vmem:[%s3310_s5 + $0x1] sm:$0x1] }
 0x192   : > { %v1830_v25 = vpop.f32.mrf.mxu0  ;;  %v1871_v26 = vpop.f32.mrf.mxu1 }
 0x193   : > { %v3234_v32 = vadd.f32 %v1871_v26, %v1830_v25  ;;  %v1958_v33 = vmax.f32 %v3232_v31, 0.0 }
 0x194   : > { %v1832_v27 = vpop.f32.mrf.mxu0  ;;  %v1873_v28 = vpop.f32.mrf.mxu1 }
 0x195   : > { %v1959_v34 = vmax.f32 %v3234_v32, 0.0 }
 0x196   : > { %v1833_v29 = vpop.f32.mrf.mxu0  ;;  %v1874_v30 = vpop.f32.mrf.mxu1 }
 0x197   : > { %v1962_v40 = vadd.f32 %v1959_v34, %v1958_v33  ;;  %v993_v30 = vld [vmem:[%s3312_s7] sm:$0xff] }
 0x1d0   : > { %v1910_v35 = vpop.f32.mrf.mxu0  ;;  %v1951_v36 = vpop.f32.mrf.mxu1 }
 0x1d1   : > { %v3238_v37 = vadd.f32 %v1951_v36, %v1910_v35 }
 0x1d2   : > { %v1912_v38 = vpop.f32.mrf.mxu0  ;;  %v1953_v39 = vpop.f32.mrf.mxu1 }
 0x1d3   : > { %v1960_v41 = vmax.f32 %v3238_v37, 0.0  ;;  %v3245_v42 = vadd.f32 %v1953_v39, %v1912_v38 }
 0x1d4   : > { %v1914_v43 = vpop.f32.mrf.mxu0  ;;  %v1955_v44 = vpop.f32.mrf.mxu1 }
 0x1d5   : > { %v1963_v45 = vadd.f32 %v1962_v40, %v1960_v41  ;;  %v1961_v46 = vmax.f32 %v3245_v42, 0.0 }
 0x1d6   : > { %v1915_v47 = vpop.f32.mrf.mxu0  ;;  %v1956_v48 = vpop.f32.mrf.mxu1 }
 0x1d7   : > { %v1964_v49 = vadd.f32 %v1963_v45, %v1961_v46 }
 0x1d9   : > { %1965 = vadd.xlane.f32.xlu0 %v1964_v49 }
 0x1e4   : > { %v969_v51 = vpop.xlane.xlu0 %968 }
 0x1e5   : > { %v971_v52 = vmul.f32 0.001953125, %v969_v51 }
 0x1e7   : > { %v973_v53 = vmul.f32 %v972_v50, %v971_v52 }
 0x1e9   : > { %v975_v54 = vsel %vm974_vm0, %v973_v53, 0.0 }
 0x1ea   : > { %v976_v55 = vrot.slane %v975_v54, 4 }
 0x1ec   : > { %v977_v56 = vadd.f32 %v976_v55, %v975_v54 }
 0x1ee   : > { %v978_v58 = vrot.slane %v977_v56, 2 }
 0x1f0   : > { %v979_v59 = vadd.f32 %v978_v58, %v977_v56 }
 0x1f2   : > { %v980_v61 = vrot.slane %v979_v59, 1 }
 0x1f4   : > { %v981_v63 = vadd.f32 %v980_v61, %v979_v59 }
 0x1f6   : > { %v983_v1 = vadd.f32 %v982_v62, %v981_v63 }
 0x1f8   : > { %v988_v3 = vrot.slane %v983_v1, %v987_v0 }
 0x1fa   : > { %v989_v6 = vmul.f32 %v988_v3, %v984_v2 }
 0x1fc   : > { %v990_v7 = vsel %vm974_vm0, %v989_v6, 0.0 }
 0x1fd   : > { %991 = vadd.xlane.f32.xlu1 %v990_v7 }
 0x262   : > { %v1966_v9 = vpop.xlane.xlu0 %1965 }
 0x263   : > { %v1967_v5 = vmul.f32 0.001953125, %v1966_v9 }
 0x265   : > { %v1970_v19 = vmul.f32 %v2273_v8, %v1967_v5 }
 0x267   : > { %v1971_v12 = vsel %vm974_vm0, %v1970_v19, 0.0 }
 0x268   : > { %v1972_v13 = vrot.slane %v1971_v12, 4 }
 0x26a   : > { %v1973_v21 = vadd.f32 %v1972_v13, %v1971_v12 }
 0x26c   : > { %v1974_v23 = vrot.slane %v1973_v21, 2 }
 0x26e   : > { %v1975_v24 = vadd.f32 %v1974_v23, %v1973_v21 }
 0x270   : > { %v1976_v10 = vrot.slane %v1975_v24, 1 }
 0x272   : > { %v1977_v25 = vadd.f32 %v1976_v10, %v1975_v24 }
 0x274   : > { %v1980_v26 = vadd.f32 %v2274_v11, %v1977_v25 }
 0x276   : > { %v1984_v27 = vrot.slane %v1980_v26, %v987_v0 }
 0x278   : > { %v1985_v28 = vmul.f32 %v1984_v27, %v984_v2 }
 0x27a   : > { %v1986_v29 = vsel %vm974_vm0, %v1985_v28, 0.0 }
 0x27b   : > { %1987 = vadd.xlane.f32.xlu1 %v1986_v29 }
 0x286   : > { %v992_v35 = vpop.xlane.xlu1 %991 }
 0x287   : > { %v994_v36 = vadd.f32 %v993_v30, %v992_v35 }
 0x289   : > { %v2140_v38 = vmul.f32 -1.442695, %v994_v36 }
 0x28b   : > { %2551 = vpow2.f32 %v2140_v38 }
 0x298   : > { %v2552_v39 = vpop.eup %2551 }
 0x299   : > { %v998_v40 = vadd.f32 1.0, %v2552_v39 }
 0x29b   : > { %2553 = vrcp.f32 %v998_v40 }
 0x2a8   : > { %v2554_v43 = vpop.eup %2553 }
 0x2a9   : > { %1003 = vperm.xlu0 %2305, %v2554_v43  }
 0x304   : > { %v1988_v44 = vpop.xlane.xlu1 %1987 }
 0x305   : > { %v1989_v45 = vadd.f32 %v1988_v44, %v993_v30 }
 0x307   : > { %v2275_v47 = vmul.f32 -1.442695, %v1989_v45 }
 0x309   : > { %2555 = vpow2.f32 %v2275_v47 }
 0x316   : > { %v2556_v48 = vpop.eup %2555 }
 0x317   : > { %v1993_v49 = vadd.f32 1.0, %v2556_v48 }
 0x319   : > { %2557 = vrcp.f32 %v1993_v49 }
 0x324   : > { %v1004_v51 = vpop.permute.xlu0 %1003 }
 0x325   : > { %v1006_v52 = vmul.f32 %v1004_v51, %v961_v16  ;;  %v1007_v54 = vmul.f32 %v1004_v51, %v962_v18  ;;  %v1008_v16 = vmul.f32 %v1004_v51, %v963_v20  ;;  %v1009_v31 = vmul.f32 %v1004_v51, %v964_v22 }
 0x326   : > { %v2558_v50 = vpop.eup %2557 }
 0x327   : > { %1998 = vperm.xlu1 %2306, %v2558_v50  }
 0x3a2   : > { %v1999_v53 = vpop.permute.xlu1 %1998 }
 0x3a3   : > { %v2001_v55 = vmul.f32 %v1999_v53, %v1958_v33  ;;  %v2002_v56 = vmul.f32 %v1999_v53, %v1959_v34  ;;  %v2003_v57 = vmul.f32 %v1999_v53, %v1960_v41  ;;  %v2004_v14 = vmul.f32 %v1999_v53, %v1961_v46 }
 0x3a5   : > { %v2005_v17 = vadd.f32 %v2001_v55, %v1006_v52  ;;  %v2006_v18 = vadd.f32 %v2002_v56, %v1007_v54  ;;  %v2007_v32 = vadd.f32 %v2003_v57, %v1008_v16  ;;  %v2008_v33 = vadd.f32 %v2004_v14, %v1009_v31 }
 0x3a7   : > { %2009 = vst [vmem:[%s683_s19] sm:$0xff] %v2005_v17  ;;  %2010 = vst [vmem:[%s683_s19 + $0x8] sm:$0xff] %v2006_v18 }
 0x3a8   : > { %2011 = vst [vmem:[%s683_s19 + $0x10] sm:$0xff] %v2007_v32  ;;  %2012 = vst [vmem:[%s683_s19 + $0x18] sm:$0xff] %v2008_v33 }
 0x3a9 PF: > { %p15_p9 = scmp.ge.s32.totalorder %s2646_s9, 4   ;;  %s3315_s27 = smov %s2577_s28 }
 0x3aa   : > { %s3316_s28 = smov %s2655_s12  ;;  %s3317_s29 = smov %s2646_s9 }
 0x3ab   :  { %17 = sbr.rel (!%p15_p9) target bundleno = 2 (0x2), region = 143 }

</bundles_post_ra>
